<compile_context>
chip_gen: v7x
topology: tpu7x:2x2x1
jax: 0.10.0
libtpu: 0.0.40
codegen_flags: <defaults>
</compile_context>

<pallas_src>
import functools

import jax
import jax.numpy as jnp
from jax.experimental import pallas as pl
from jax.experimental.pallas import tpu as pltpu

LANES = 128  # padded feature width of every layer (8*16, 8*16, 1*100 -> 128)


# --------------------------------------------------------------------------
# Fused Pallas kernel: conv1 -> leaky_relu -> conv2 -> leaky_relu -> conv3
# --------------------------------------------------------------------------
def _gat3_kernel(x_ref, adj_ref,
                 w1_ref, b1_ref, w2_ref, b2_ref, w3_ref, b3_ref,
                 ex_ref, seg_ref, vm_ref,
                 out_ref, *, heads, chans, groups):
    N = adj_ref.shape[0]
    adj = adj_ref[...]                                   # [N, N], adj[i,j]: edge j -> i
    neg = jnp.float32(-1e30)
    eps = jnp.float32(1e-20)

    # adjacency mask tiled once along lanes for the head-packed layers (1 & 2)
    g12 = groups[0]
    adj_packed = jnp.tile(adj, (1, g12)) if g12 > 1 else adj

    def gat_layer(x, w_ref, b_ref, H, C, G):
        # One fused MXU matmul: [h_all | a_src | a_dst]  (W@A folded on host)
        proj = jnp.dot(x, w_ref[...], preferred_element_type=jnp.float32)   # [N, 256]
        h_all = proj[:, :LANES]                                             # [N, 128]
        a_dst = proj[:, LANES + H:LANES + 2 * H]                            # [N, H]
        # Only the src-logit columns get transposed (kept >= 8 lanes wide).
        tw = max(H, 8)
        a_srcT = proj[:, LANES:LANES + tw].T                                # [tw, N]

        outs = []
        if G > 1:
            EX = ex_ref[...]            # [G, G*N]  lane-block expander
            SEG = seg_ref[...]          # [G*N, G]  segmented ones (denominator)
            VM = vm_ref[...]            # [G*N, G*C] block-diagonal value mask
            for grp in range(H // G):   # short static loop (2 iterations)
                h0 = grp * G
                # e[i, g*N+j] = a_dst[i, h0+g] + a_src[j, h0+g]
                e = jnp.dot(a_dst[:, h0:h0 + G], EX,
                            preferred_element_type=jnp.float32)             # [N, G*N]
                src_row = jnp.concatenate(
                    [a_srcT[h0 + g:h0 + g + 1, :] for g in range(G)], axis=1)  # [1, G*N]
                e = e + src_row
                e = jnp.where(e > 0, e, 0.2 * e)                  # leaky_relu(0.2)
                e = jnp.where(adj_packed > 0, e, neg)             # masked logits
                m = jnp.max(e, axis=-1, keepdims=True)            # masked row max
                p = jnp.exp(e - m)                                # masked entries -> 0
                # denominators per head on the MXU, then exact normalization of p
                den = jnp.dot(p, SEG, preferred_element_type=jnp.float32)   # [N, G]
                inv = 1.0 / jnp.maximum(den, eps)
                p = p * jnp.dot(inv, EX, preferred_element_type=jnp.float32)
                # batched aggregation: block-diagonal value matrix via tile + mask
                v_blk = jnp.tile(h_all[:, h0 * C:(h0 + G) * C], (G, 1)) * VM  # [G*N, G*C]
                outs.append(jnp.dot(p, v_blk,
                                    preferred_element_type=jnp.float32))     # [N, G*C]
        else:
            for h in range(H):
                e = a_dst[:, h:h + 1] + a_srcT[h:h + 1, :]                   # [N, N]
                e = jnp.where(e > 0, e, 0.2 * e)
                e = jnp.where(adj > 0, e, neg)
                m = jnp.max(e, axis=-1, keepdims=True)
                p = jnp.exp(e - m)
                den = jnp.sum(p, axis=-1, keepdims=True)
                p = p * (1.0 / jnp.maximum(den, eps))
                outs.append(jnp.dot(p, h_all[:, h * C:(h + 1) * C],
                                    preferred_element_type=jnp.float32))

        out = outs[0] if len(outs) == 1 else jnp.concatenate(outs, axis=1)   # [N, 128]
        return out + b_ref[...]

    # ---- conv1 + F.leaky_relu(0.01); dropout = identity (eval) ----
    x1 = gat_layer(x_ref[...], w1_ref, b1_ref, heads[0], chans[0], groups[0])
    x1 = jnp.where(x1 > 0, x1, 0.01 * x1)
    # ---- conv2 + F.leaky_relu(0.01); dropout = identity ----
    x2 = gat_layer(x1, w2_ref, b2_ref, heads[1], chans[1], groups[1])
    x2 = jnp.where(x2 > 0, x2, 0.01 * x2)
    # ---- conv3 (no activation); single lane-dense [N,128] store ----
    out_ref[...] = gat_layer(x2, w3_ref, b3_ref, heads[2], chans[2], groups[2])


# --------------------------------------------------------------------------
# Host-side packing helpers
# --------------------------------------------------------------------------
def _head_group_size(heads, num_nodes):
    """How many heads can share the 128 lanes (G * N <= 128, G | heads)."""
    if num_nodes >= LANES:
        return 1
    g = min(heads, LANES // num_nodes)
    while g > 1 and heads % g:
        g -= 1
    return max(g, 1)


def _make_pack_constants(N, G, C):
    """Constants for lane-packing G heads per [N, G*N] block."""
    E = jnp.zeros((G, G * N), jnp.float32)       # dst / reciprocal lane expander
    S = jnp.zeros((G * N, G), jnp.float32)       # segmented ones (MXU denominator)
    V = jnp.zeros((G * N, G * C), jnp.float32)   # block-diagonal value mask
    for g in range(G):
        E = E.at[g, g * N:(g + 1) * N].set(1.0)
        S = S.at[g * N:(g + 1) * N, g].set(1.0)
        V = V.at[g * N:(g + 1) * N, g * C:(g + 1) * C].set(1.0)
    return E, S, V


def make_gatconv_params(key, in_channels, out_channels, heads):
    """Shapes match PyG GATConv(in_channels, out_channels, heads)."""
    HC = heads * out_channels
    k_w, k_as, k_ad = jax.random.split(key, 3)
    # lin_src.weight.data.normal_(0, 0.001); stored transposed: [F_in, H*C]
    w_src = 0.001 * jax.random.normal(k_w, (in_channels, HC), jnp.float32)
    scale = jnp.sqrt(6.0 / (out_channels + 1.0))
    att_src = scale * jax.random.uniform(k_as, (heads, out_channels),
                                         jnp.float32, -1.0, 1.0)
    att_dst = scale * jax.random.uniform(k_ad, (heads, out_channels),
                                         jnp.float32, -1.0, 1.0)
    bias = jnp.zeros((HC,), jnp.float32)     # PyG default: zeros
    # lin_dst exists in the PyTorch module but is unused for a single input
    # tensor (x_src == x_dst == lin_src(x)), so it is not materialized here.
    return dict(w=w_src, att_src=att_src, att_dst=att_dst, bias=bias)


def _pack_layer(p):
    """Pack one layer into a single fused lane-dense weight.

    Returns (wcat:[F_in, 2*LANES], b:[1, LANES]) where
      wcat[:, :H*C]          = W                       (lin_src, transposed)
      wcat[:, LANES + h]     = W_h @ att_src[h]        (W@A fold, src logits)
      wcat[:, LANES + H + h] = W_h @ att_dst[h]        (W@A fold, dst logits)
    so one MXU matmul x @ wcat yields [h_all | a_src | a_dst].
    """
    w, att_src, att_dst, bias = p["w"], p["att_src"], p["att_dst"], p["bias"]
    F_in = w.shape[0]
    H, C = att_src.shape
    HC = H * C
    w_r = w.reshape(F_in, H, C)
    wa_src = jnp.einsum("fhc,hc->fh", w_r, att_src)
    wa_dst = jnp.einsum("fhc,hc->fh", w_r, att_dst)
    wcat = jnp.zeros((F_in, 2 * LANES), jnp.float32)
    wcat = wcat.at[:, :HC].set(w)
    wcat = wcat.at[:, LANES:LANES + H].set(wa_src)
    wcat = wcat.at[:, LANES + H:LANES + 2 * H].set(wa_dst)
    b = jnp.zeros((1, LANES), jnp.float32).at[:, :HC].set(bias[None, :])
    return wcat, b


# --------------------------------------------------------------------------
# Wrapper
# --------------------------------------------------------------------------
def gat3_forward(x, adj, layer1, layer2, layer3, *, heads, chans, out_dim):
    """x:[N,F_in], adj:[N,N]; layer* = (wcat:[F_in,256], b:[1,128])."""
    N, F_in = x.shape
    w1, b1 = layer1
    w2, b2 = layer2
    w3, b3 = layer3

    assert heads[0] == heads[1] and chans[0] == chans[1]
    G12 = _head_group_size(heads[0], N)
    groups = (G12, G12, 1)                       # conv3 has a single head
    if G12 > 1:
        E, S, V = _make_pack_constants(N, G12, chans[0])
    else:                                        # unused dummies (G==1 path)
        E = jnp.zeros((1, N), jnp.float32)
        S = jnp.zeros((N, 1), jnp.float32)
        V = jnp.zeros((N, chans[0]), jnp.float32)

    # advisory cost estimate
    flops = 0
    for fin, H, C in ((F_in, heads[0], chans[0]),
                      (LANES, heads[1], chans[1]),
                      (LANES, heads[2], chans[2])):
        flops += 2 * N * fin * 2 * LANES        # fused projection + logits
        flops += 2 * N * N * H * C              # attention-weighted aggregation
        flops += 8 * N * N * H                  # logit build / mask / softmax
    transc = N * N * sum(heads)
    bytes_accessed = 4 * (x.size + adj.size + w1.size + w2.size + w3.size
                          + b1.size + b2.size + b3.size
                          + E.size + S.size + V.size + N * LANES)
    cost = pl.CostEstimate(flops=int(flops), transcendentals=int(transc),
                           bytes_accessed=int(bytes_accessed))

    kernel = functools.partial(_gat3_kernel, heads=heads, chans=chans,
                               groups=groups)
    full = lambda i: (0, 0)
    operands = (x, adj, w1, b1, w2, b2, w3, b3, E, S, V)

    out = pl.pallas_call(
        kernel,
        out_shape=jax.ShapeDtypeStruct((N, LANES), jnp.float32),
        grid=(1,),
        in_specs=[pl.BlockSpec(a.shape, full) for a in operands],
        out_specs=pl.BlockSpec((N, LANES), full),
        compiler_params=pltpu.CompilerParams(
            dimension_semantics=("arbitrary",),
            vmem_limit_bytes=32 * 1024 * 1024),
        cost_estimate=cost,
    )(*operands)

    # un-pad the final layer's channels (conv3: 100 real channels)
    return out[:, :out_dim]


class GAT:
    """Mirrors the PyTorch GAT module (inference mode: dropout is identity)."""

    def __init__(self, m, key):
        k1, k2, k3 = jax.random.split(key, 3)
        p1 = make_gatconv_params(k1, m + 2, 16, 8)    # -> 128
        p2 = make_gatconv_params(k2, 128, 16, 8)      # -> 128
        p3 = make_gatconv_params(k3, 128, 100, 1)     # -> 100 (padded to 128)
        self.layer1 = _pack_layer(p1)
        self.layer2 = _pack_layer(p2)
        self.layer3 = _pack_layer(p3)
        self.heads = (8, 8, 1)
        self.chans = (16, 16, LANES)   # per-head width inside the kernel (conv3 padded)
        self.out_dim = 100

    def __call__(self, x, adj):
        return gat3_forward(x, adj, self.layer1, self.layer2, self.layer3,
                            heads=self.heads, chans=self.chans,
                            out_dim=self.out_dim)


def edge_index_to_dense_adj(edge_index, num_nodes):
    """adj[i, j] = 1 for edge j -> i; self-loops added (GATConv default)."""
    src, dst = edge_index[0], edge_index[1]
    adj = jnp.zeros((num_nodes, num_nodes), jnp.float32)
    adj = adj.at[dst, src].set(1.0)
    adj = adj.at[jnp.arange(num_nodes), jnp.arange(num_nodes)].set(1.0)
    return adj


# --------------------------------------------------------------------------
if __name__ == "__main__":
    key = jax.random.PRNGKey(0)
    k_x, k_params = jax.random.split(key)

    N = 32          # nodes
    m = 6           # -> conv1 input dim = m + 2 = 8

    # node features
    x = jax.random.normal(k_x, (N, m + 2), jnp.float32)

    # deterministic edge_index: bidirectional ring graph, shape [2, 2N]
    idx = jnp.arange(N)
    nxt = (idx + 1) % N
    edge_index = jnp.stack([jnp.concatenate([idx, nxt]),
                            jnp.concatenate([nxt, idx])], axis=0)  # [2, 64]

    adj = edge_index_to_dense_adj(edge_index, N)

    model = GAT(m, k_params)
    out = model(x, adj)
    out = jax.block_until_ready(out)

    assert out.shape == (N, 100), out.shape
    assert bool(jnp.all(jnp.isfinite(out)))
    print("KERNEL_OK")
</pallas_src>

<mosaic_0001>
module attributes {stable_mosaic.version = 11 : i64} {
  func.func @_gat3_kernel(%arg0: i32, %arg1: memref<32x8xf32, #tpu.memory_space<vmem>>, %arg2: memref<32x32xf32, #tpu.memory_space<vmem>>, %arg3: memref<8x256xf32, #tpu.memory_space<vmem>>, %arg4: memref<1x128xf32, #tpu.memory_space<vmem>>, %arg5: memref<128x256xf32, #tpu.memory_space<vmem>>, %arg6: memref<1x128xf32, #tpu.memory_space<vmem>>, %arg7: memref<128x256xf32, #tpu.memory_space<vmem>>, %arg8: memref<1x128xf32, #tpu.memory_space<vmem>>, %arg9: memref<4x128xf32, #tpu.memory_space<vmem>>, %arg10: memref<128x4xf32, #tpu.memory_space<vmem>>, %arg11: memref<128x64xf32, #tpu.memory_space<vmem>>, %arg12: memref<32x128xf32, #tpu.memory_space<vmem>>) attributes {dimension_semantics = [#tpu.dimension_semantics<arbitrary>], iteration_bounds = array<i64: 1>, scalar_prefetch = 0 : i64, scratch_operands = 0 : i64, tpu.core_type = #tpu.core_type<tc>, window_params = [{pipeline_mode = #tpu.pipeline_mode<synchronous>, transform_indices = @transform_0, window_bounds = array<i64: 32, 8>}, {pipeline_mode = #tpu.pipeline_mode<synchronous>, transform_indices = @transform_1, window_bounds = array<i64: 32, 32>}, {pipeline_mode = #tpu.pipeline_mode<synchronous>, transform_indices = @transform_2, window_bounds = array<i64: 8, 256>}, {pipeline_mode = #tpu.pipeline_mode<synchronous>, transform_indices = @transform_3, window_bounds = array<i64: 1, 128>}, {pipeline_mode = #tpu.pipeline_mode<synchronous>, transform_indices = @transform_4, window_bounds = array<i64: 128, 256>}, {pipeline_mode = #tpu.pipeline_mode<synchronous>, transform_indices = @transform_5, window_bounds = array<i64: 1, 128>}, {pipeline_mode = #tpu.pipeline_mode<synchronous>, transform_indices = @transform_6, window_bounds = array<i64: 128, 256>}, {pipeline_mode = #tpu.pipeline_mode<synchronous>, transform_indices = @transform_7, window_bounds = array<i64: 1, 128>}, {pipeline_mode = #tpu.pipeline_mode<synchronous>, transform_indices = @transform_8, window_bounds = array<i64: 4, 128>}, {pipeline_mode = #tpu.pipeline_mode<synchronous>, transform_indices = @transform_9, window_bounds = array<i64: 128, 4>}, {pipeline_mode = #tpu.pipeline_mode<synchronous>, transform_indices = @transform_10, window_bounds = array<i64: 128, 64>}, {pipeline_mode = #tpu.pipeline_mode<synchronous>, transform_indices = @transform_11, window_bounds = array<i64: 32, 128>}]} {
    %c0 = arith.constant 0 : index
    %c0_0 = arith.constant 0 : index
    %0 = vector.load %arg2[%c0, %c0_0] : memref<32x32xf32, #tpu.memory_space<vmem>>, vector<32x32xf32>
    %1 = tpu.concatenate %0, %0, %0, %0 in 1 : vector<32x32xf32>, vector<32x32xf32>, vector<32x32xf32>, vector<32x32xf32> -> vector<32x128xf32>
    %c0_1 = arith.constant 0 : index
    %c0_2 = arith.constant 0 : index
    %2 = vector.load %arg1[%c0_1, %c0_2] : memref<32x8xf32, #tpu.memory_space<vmem>>, vector<32x8xf32>
    %c0_3 = arith.constant 0 : index
    %c0_4 = arith.constant 0 : index
    %3 = vector.load %arg3[%c0_3, %c0_4] : memref<8x256xf32, #tpu.memory_space<vmem>>, vector<8x256xf32>
    %cst = arith.constant dense<0.000000e+00> : vector<32x256xf32>
    %4 = tpu.matmul %2, %3, %cst {dimension_numbers = #tpu.dot_dimension_numbers<[1], [0], [0], [1], [0, 0, 1, 1], [], []>} : vector<32x8xf32>, vector<8x256xf32>, vector<32x256xf32> -> vector<32x256xf32>
    %5 = vector.extract_strided_slice %4 {offsets = [0, 0], sizes = [32, 128], strides = [1, 1]} : vector<32x256xf32> to vector<32x128xf32>
    %6 = vector.extract_strided_slice %4 {offsets = [0, 136], sizes = [32, 8], strides = [1, 1]} : vector<32x256xf32> to vector<32x8xf32>
    %7 = vector.extract_strided_slice %4 {offsets = [0, 128], sizes = [32, 8], strides = [1, 1]} : vector<32x256xf32> to vector<32x8xf32>
    %8 = tpu.transpose %7, [1, 0] : vector<32x8xf32> -> vector<8x32xf32>
    %c0_5 = arith.constant 0 : index
    %c0_6 = arith.constant 0 : index
    %9 = vector.load %arg9[%c0_5, %c0_6] : memref<4x128xf32, #tpu.memory_space<vmem>>, vector<4x128xf32>
    %c0_7 = arith.constant 0 : index
    %c0_8 = arith.constant 0 : index
    %10 = vector.load %arg10[%c0_7, %c0_8] : memref<128x4xf32, #tpu.memory_space<vmem>>, vector<128x4xf32>
    %c0_9 = arith.constant 0 : index
    %c0_10 = arith.constant 0 : index
    %11 = vector.load %arg11[%c0_9, %c0_10] : memref<128x64xf32, #tpu.memory_space<vmem>>, vector<128x64xf32>
    %12 = vector.extract_strided_slice %6 {offsets = [0, 0], sizes = [32, 4], strides = [1, 1]} : vector<32x8xf32> to vector<32x4xf32>
    %cst_11 = arith.constant dense<0.000000e+00> : vector<32x128xf32>
    %13 = tpu.matmul %12, %9, %cst_11 {dimension_numbers = #tpu.dot_dimension_numbers<[1], [0], [0], [1], [0, 0, 1, 1], [], []>} : vector<32x4xf32>, vector<4x128xf32>, vector<32x128xf32> -> vector<32x128xf32>
    %14 = vector.extract_strided_slice %8 {offsets = [0, 0], sizes = [1, 32], strides = [1, 1]} : vector<8x32xf32> to vector<1x32xf32>
    %15 = vector.extract_strided_slice %8 {offsets = [1, 0], sizes = [1, 32], strides = [1, 1]} : vector<8x32xf32> to vector<1x32xf32>
    %16 = vector.extract_strided_slice %8 {offsets = [2, 0], sizes = [1, 32], strides = [1, 1]} : vector<8x32xf32> to vector<1x32xf32>
    %17 = vector.extract_strided_slice %8 {offsets = [3, 0], sizes = [1, 32], strides = [1, 1]} : vector<8x32xf32> to vector<1x32xf32>
    %18 = tpu.concatenate %14, %15, %16, %17 in 1 : vector<1x32xf32>, vector<1x32xf32>, vector<1x32xf32>, vector<1x32xf32> -> vector<1x128xf32>
    %19 = vector.broadcast %18 : vector<1x128xf32> to vector<32x128xf32>
    %20 = arith.addf %13, %19 : vector<32x128xf32>
    %cst_12 = arith.constant 0.000000e+00 : f32
    %21 = vector.broadcast %cst_12 : f32 to vector<32x128xf32>
    %22 = arith.cmpf ogt, %20, %21 : vector<32x128xf32>
    %cst_13 = arith.constant 2.000000e-01 : f32
    %23 = vector.broadcast %cst_13 : f32 to vector<32x128xf32>
    %24 = arith.mulf %23, %20 : vector<32x128xf32>
    %25 = arith.select %22, %20, %24 : vector<32x128xi1>, vector<32x128xf32>
    %cst_14 = arith.constant 0.000000e+00 : f32
    %26 = vector.broadcast %cst_14 : f32 to vector<32x128xf32>
    %27 = arith.cmpf ogt, %1, %26 : vector<32x128xf32>
    %cst_15 = arith.constant -1.000000e+30 : f32
    %28 = vector.broadcast %cst_15 : f32 to vector<32x128xf32>
    %29 = arith.select %27, %25, %28 : vector<32x128xi1>, vector<32x128xf32>
    %cst_16 = arith.constant dense<0xFF800000> : vector<32xf32>
    %30 = vector.multi_reduction <maximumf>, %29, %cst_16 [1] : vector<32x128xf32> to vector<32xf32>
    %31 = vector.shape_cast %30 : vector<32xf32> to vector<32x1xf32>
    %32 = vector.broadcast %31 : vector<32x1xf32> to vector<32x128xf32>
    %33 = arith.subf %29, %32 : vector<32x128xf32>
    %34 = math.exp %33 : vector<32x128xf32>
    %cst_17 = arith.constant dense<0.000000e+00> : vector<32x4xf32>
    %35 = tpu.matmul %34, %10, %cst_17 {dimension_numbers = #tpu.dot_dimension_numbers<[1], [0], [0], [1], [0, 0, 1, 1], [], []>} : vector<32x128xf32>, vector<128x4xf32>, vector<32x4xf32> -> vector<32x4xf32>
    %cst_18 = arith.constant 9.99999968E-21 : f32
    %36 = vector.broadcast %cst_18 : f32 to vector<32x4xf32>
    %37 = arith.maximumf %35, %36 : vector<32x4xf32>
    %cst_19 = arith.constant 1.000000e+00 : f32
    %38 = vector.broadcast %cst_19 : f32 to vector<32x4xf32>
    %39 = arith.divf %38, %37 : vector<32x4xf32>
    %cst_20 = arith.constant dense<0.000000e+00> : vector<32x128xf32>
    %40 = tpu.matmul %39, %9, %cst_20 {dimension_numbers = #tpu.dot_dimension_numbers<[1], [0], [0], [1], [0, 0, 1, 1], [], []>} : vector<32x4xf32>, vector<4x128xf32>, vector<32x128xf32> -> vector<32x128xf32>
    %41 = arith.mulf %34, %40 : vector<32x128xf32>
    %42 = vector.extract_strided_slice %5 {offsets = [0, 0], sizes = [32, 64], strides = [1, 1]} : vector<32x128xf32> to vector<32x64xf32>
    %43 = tpu.concatenate %42, %42, %42, %42 in 0 : vector<32x64xf32>, vector<32x64xf32>, vector<32x64xf32>, vector<32x64xf32> -> vector<128x64xf32>
    %44 = arith.mulf %43, %11 : vector<128x64xf32>
    %cst_21 = arith.constant dense<0.000000e+00> : vector<32x64xf32>
    %45 = tpu.matmul %41, %44, %cst_21 {dimension_numbers = #tpu.dot_dimension_numbers<[1], [0], [0], [1], [0, 0, 1, 1], [], []>} : vector<32x128xf32>, vector<128x64xf32>, vector<32x64xf32> -> vector<32x64xf32>
    %46 = vector.extract_strided_slice %6 {offsets = [0, 4], sizes = [32, 4], strides = [1, 1]} : vector<32x8xf32> to vector<32x4xf32>
    %cst_22 = arith.constant dense<0.000000e+00> : vector<32x128xf32>
    %47 = tpu.matmul %46, %9, %cst_22 {dimension_numbers = #tpu.dot_dimension_numbers<[1], [0], [0], [1], [0, 0, 1, 1], [], []>} : vector<32x4xf32>, vector<4x128xf32>, vector<32x128xf32> -> vector<32x128xf32>
    %48 = vector.extract_strided_slice %8 {offsets = [4, 0], sizes = [1, 32], strides = [1, 1]} : vector<8x32xf32> to vector<1x32xf32>
    %49 = vector.extract_strided_slice %8 {offsets = [5, 0], sizes = [1, 32], strides = [1, 1]} : vector<8x32xf32> to vector<1x32xf32>
    %50 = vector.extract_strided_slice %8 {offsets = [6, 0], sizes = [1, 32], strides = [1, 1]} : vector<8x32xf32> to vector<1x32xf32>
    %51 = vector.extract_strided_slice %8 {offsets = [7, 0], sizes = [1, 32], strides = [1, 1]} : vector<8x32xf32> to vector<1x32xf32>
    %52 = tpu.concatenate %48, %49, %50, %51 in 1 : vector<1x32xf32>, vector<1x32xf32>, vector<1x32xf32>, vector<1x32xf32> -> vector<1x128xf32>
    %53 = vector.broadcast %52 : vector<1x128xf32> to vector<32x128xf32>
    %54 = arith.addf %47, %53 : vector<32x128xf32>
    %cst_23 = arith.constant 0.000000e+00 : f32
    %55 = vector.broadcast %cst_23 : f32 to vector<32x128xf32>
    %56 = arith.cmpf ogt, %54, %55 : vector<32x128xf32>
    %cst_24 = arith.constant 2.000000e-01 : f32
    %57 = vector.broadcast %cst_24 : f32 to vector<32x128xf32>
    %58 = arith.mulf %57, %54 : vector<32x128xf32>
    %59 = arith.select %56, %54, %58 : vector<32x128xi1>, vector<32x128xf32>
    %cst_25 = arith.constant 0.000000e+00 : f32
    %60 = vector.broadcast %cst_25 : f32 to vector<32x128xf32>
    %61 = arith.cmpf ogt, %1, %60 : vector<32x128xf32>
    %cst_26 = arith.constant -1.000000e+30 : f32
    %62 = vector.broadcast %cst_26 : f32 to vector<32x128xf32>
    %63 = arith.select %61, %59, %62 : vector<32x128xi1>, vector<32x128xf32>
    %cst_27 = arith.constant dense<0xFF800000> : vector<32xf32>
    %64 = vector.multi_reduction <maximumf>, %63, %cst_27 [1] : vector<32x128xf32> to vector<32xf32>
    %65 = vector.shape_cast %64 : vector<32xf32> to vector<32x1xf32>
    %66 = vector.broadcast %65 : vector<32x1xf32> to vector<32x128xf32>
    %67 = arith.subf %63, %66 : vector<32x128xf32>
    %68 = math.exp %67 : vector<32x128xf32>
    %cst_28 = arith.constant dense<0.000000e+00> : vector<32x4xf32>
    %69 = tpu.matmul %68, %10, %cst_28 {dimension_numbers = #tpu.dot_dimension_numbers<[1], [0], [0], [1], [0, 0, 1, 1], [], []>} : vector<32x128xf32>, vector<128x4xf32>, vector<32x4xf32> -> vector<32x4xf32>
    %cst_29 = arith.constant 9.99999968E-21 : f32
    %70 = vector.broadcast %cst_29 : f32 to vector<32x4xf32>
    %71 = arith.maximumf %69, %70 : vector<32x4xf32>
    %cst_30 = arith.constant 1.000000e+00 : f32
    %72 = vector.broadcast %cst_30 : f32 to vector<32x4xf32>
    %73 = arith.divf %72, %71 : vector<32x4xf32>
    %cst_31 = arith.constant dense<0.000000e+00> : vector<32x128xf32>
    %74 = tpu.matmul %73, %9, %cst_31 {dimension_numbers = #tpu.dot_dimension_numbers<[1], [0], [0], [1], [0, 0, 1, 1], [], []>} : vector<32x4xf32>, vector<4x128xf32>, vector<32x128xf32> -> vector<32x128xf32>
    %75 = arith.mulf %68, %74 : vector<32x128xf32>
    %76 = vector.extract_strided_slice %5 {offsets = [0, 64], sizes = [32, 64], strides = [1, 1]} : vector<32x128xf32> to vector<32x64xf32>
    %77 = tpu.concatenate %76, %76, %76, %76 in 0 : vector<32x64xf32>, vector<32x64xf32>, vector<32x64xf32>, vector<32x64xf32> -> vector<128x64xf32>
    %78 = arith.mulf %77, %11 : vector<128x64xf32>
    %cst_32 = arith.constant dense<0.000000e+00> : vector<32x64xf32>
    %79 = tpu.matmul %75, %78, %cst_32 {dimension_numbers = #tpu.dot_dimension_numbers<[1], [0], [0], [1], [0, 0, 1, 1], [], []>} : vector<32x128xf32>, vector<128x64xf32>, vector<32x64xf32> -> vector<32x64xf32>
    %80 = tpu.concatenate %45, %79 in 1 : vector<32x64xf32>, vector<32x64xf32> -> vector<32x128xf32>
    %c0_33 = arith.constant 0 : index
    %c0_34 = arith.constant 0 : index
    %81 = vector.load %arg4[%c0_33, %c0_34] : memref<1x128xf32, #tpu.memory_space<vmem>>, vector<1x128xf32>
    %82 = vector.broadcast %81 : vector<1x128xf32> to vector<32x128xf32>
    %83 = arith.addf %80, %82 : vector<32x128xf32>
    %cst_35 = arith.constant 0.000000e+00 : f32
    %84 = vector.broadcast %cst_35 : f32 to vector<32x128xf32>
    %85 = arith.cmpf ogt, %83, %84 : vector<32x128xf32>
    %cst_36 = arith.constant 0.00999999977 : f32
    %86 = vector.broadcast %cst_36 : f32 to vector<32x128xf32>
    %87 = arith.mulf %86, %83 : vector<32x128xf32>
    %88 = arith.select %85, %83, %87 : vector<32x128xi1>, vector<32x128xf32>
    %c0_37 = arith.constant 0 : index
    %c0_38 = arith.constant 0 : index
    %89 = vector.load %arg5[%c0_37, %c0_38] : memref<128x256xf32, #tpu.memory_space<vmem>>, vector<128x256xf32>
    %cst_39 = arith.constant dense<0.000000e+00> : vector<32x256xf32>
    %90 = tpu.matmul %88, %89, %cst_39 {dimension_numbers = #tpu.dot_dimension_numbers<[1], [0], [0], [1], [0, 0, 1, 1], [], []>} : vector<32x128xf32>, vector<128x256xf32>, vector<32x256xf32> -> vector<32x256xf32>
    %91 = vector.extract_strided_slice %90 {offsets = [0, 0], sizes = [32, 128], strides = [1, 1]} : vector<32x256xf32> to vector<32x128xf32>
    %92 = vector.extract_strided_slice %90 {offsets = [0, 136], sizes = [32, 8], strides = [1, 1]} : vector<32x256xf32> to vector<32x8xf32>
    %93 = vector.extract_strided_slice %90 {offsets = [0, 128], sizes = [32, 8], strides = [1, 1]} : vector<32x256xf32> to vector<32x8xf32>
    %94 = tpu.transpose %93, [1, 0] : vector<32x8xf32> -> vector<8x32xf32>
    %c0_40 = arith.constant 0 : index
    %c0_41 = arith.constant 0 : index
    %95 = vector.load %arg9[%c0_40, %c0_41] : memref<4x128xf32, #tpu.memory_space<vmem>>, vector<4x128xf32>
    %c0_42 = arith.constant 0 : index
    %c0_43 = arith.constant 0 : index
    %96 = vector.load %arg10[%c0_42, %c0_43] : memref<128x4xf32, #tpu.memory_space<vmem>>, vector<128x4xf32>
    %c0_44 = arith.constant 0 : index
    %c0_45 = arith.constant 0 : index
    %97 = vector.load %arg11[%c0_44, %c0_45] : memref<128x64xf32, #tpu.memory_space<vmem>>, vector<128x64xf32>
    %98 = vector.extract_strided_slice %92 {offsets = [0, 0], sizes = [32, 4], strides = [1, 1]} : vector<32x8xf32> to vector<32x4xf32>
    %cst_46 = arith.constant dense<0.000000e+00> : vector<32x128xf32>
    %99 = tpu.matmul %98, %95, %cst_46 {dimension_numbers = #tpu.dot_dimension_numbers<[1], [0], [0], [1], [0, 0, 1, 1], [], []>} : vector<32x4xf32>, vector<4x128xf32>, vector<32x128xf32> -> vector<32x128xf32>
    %100 = vector.extract_strided_slice %94 {offsets = [0, 0], sizes = [1, 32], strides = [1, 1]} : vector<8x32xf32> to vector<1x32xf32>
    %101 = vector.extract_strided_slice %94 {offsets = [1, 0], sizes = [1, 32], strides = [1, 1]} : vector<8x32xf32> to vector<1x32xf32>
    %102 = vector.extract_strided_slice %94 {offsets = [2, 0], sizes = [1, 32], strides = [1, 1]} : vector<8x32xf32> to vector<1x32xf32>
    %103 = vector.extract_strided_slice %94 {offsets = [3, 0], sizes = [1, 32], strides = [1, 1]} : vector<8x32xf32> to vector<1x32xf32>
    %104 = tpu.concatenate %100, %101, %102, %103 in 1 : vector<1x32xf32>, vector<1x32xf32>, vector<1x32xf32>, vector<1x32xf32> -> vector<1x128xf32>
    %105 = vector.broadcast %104 : vector<1x128xf32> to vector<32x128xf32>
    %106 = arith.addf %99, %105 : vector<32x128xf32>
    %cst_47 = arith.constant 0.000000e+00 : f32
    %107 = vector.broadcast %cst_47 : f32 to vector<32x128xf32>
    %108 = arith.cmpf ogt, %106, %107 : vector<32x128xf32>
    %cst_48 = arith.constant 2.000000e-01 : f32
    %109 = vector.broadcast %cst_48 : f32 to vector<32x128xf32>
    %110 = arith.mulf %109, %106 : vector<32x128xf32>
    %111 = arith.select %108, %106, %110 : vector<32x128xi1>, vector<32x128xf32>
    %cst_49 = arith.constant 0.000000e+00 : f32
    %112 = vector.broadcast %cst_49 : f32 to vector<32x128xf32>
    %113 = arith.cmpf ogt, %1, %112 : vector<32x128xf32>
    %cst_50 = arith.constant -1.000000e+30 : f32
    %114 = vector.broadcast %cst_50 : f32 to vector<32x128xf32>
    %115 = arith.select %113, %111, %114 : vector<32x128xi1>, vector<32x128xf32>
    %cst_51 = arith.constant dense<0xFF800000> : vector<32xf32>
    %116 = vector.multi_reduction <maximumf>, %115, %cst_51 [1] : vector<32x128xf32> to vector<32xf32>
    %117 = vector.shape_cast %116 : vector<32xf32> to vector<32x1xf32>
    %118 = vector.broadcast %117 : vector<32x1xf32> to vector<32x128xf32>
    %119 = arith.subf %115, %118 : vector<32x128xf32>
    %120 = math.exp %119 : vector<32x128xf32>
    %cst_52 = arith.constant dense<0.000000e+00> : vector<32x4xf32>
    %121 = tpu.matmul %120, %96, %cst_52 {dimension_numbers = #tpu.dot_dimension_numbers<[1], [0], [0], [1], [0, 0, 1, 1], [], []>} : vector<32x128xf32>, vector<128x4xf32>, vector<32x4xf32> -> vector<32x4xf32>
    %cst_53 = arith.constant 9.99999968E-21 : f32
    %122 = vector.broadcast %cst_53 : f32 to vector<32x4xf32>
    %123 = arith.maximumf %121, %122 : vector<32x4xf32>
    %cst_54 = arith.constant 1.000000e+00 : f32
    %124 = vector.broadcast %cst_54 : f32 to vector<32x4xf32>
    %125 = arith.divf %124, %123 : vector<32x4xf32>
    %cst_55 = arith.constant dense<0.000000e+00> : vector<32x128xf32>
    %126 = tpu.matmul %125, %95, %cst_55 {dimension_numbers = #tpu.dot_dimension_numbers<[1], [0], [0], [1], [0, 0, 1, 1], [], []>} : vector<32x4xf32>, vector<4x128xf32>, vector<32x128xf32> -> vector<32x128xf32>
    %127 = arith.mulf %120, %126 : vector<32x128xf32>
    %128 = vector.extract_strided_slice %91 {offsets = [0, 0], sizes = [32, 64], strides = [1, 1]} : vector<32x128xf32> to vector<32x64xf32>
    %129 = tpu.concatenate %128, %128, %128, %128 in 0 : vector<32x64xf32>, vector<32x64xf32>, vector<32x64xf32>, vector<32x64xf32> -> vector<128x64xf32>
    %130 = arith.mulf %129, %97 : vector<128x64xf32>
    %cst_56 = arith.constant dense<0.000000e+00> : vector<32x64xf32>
    %131 = tpu.matmul %127, %130, %cst_56 {dimension_numbers = #tpu.dot_dimension_numbers<[1], [0], [0], [1], [0, 0, 1, 1], [], []>} : vector<32x128xf32>, vector<128x64xf32>, vector<32x64xf32> -> vector<32x64xf32>
    %132 = vector.extract_strided_slice %92 {offsets = [0, 4], sizes = [32, 4], strides = [1, 1]} : vector<32x8xf32> to vector<32x4xf32>
    %cst_57 = arith.constant dense<0.000000e+00> : vector<32x128xf32>
    %133 = tpu.matmul %132, %95, %cst_57 {dimension_numbers = #tpu.dot_dimension_numbers<[1], [0], [0], [1], [0, 0, 1, 1], [], []>} : vector<32x4xf32>, vector<4x128xf32>, vector<32x128xf32> -> vector<32x128xf32>
    %134 = vector.extract_strided_slice %94 {offsets = [4, 0], sizes = [1, 32], strides = [1, 1]} : vector<8x32xf32> to vector<1x32xf32>
    %135 = vector.extract_strided_slice %94 {offsets = [5, 0], sizes = [1, 32], strides = [1, 1]} : vector<8x32xf32> to vector<1x32xf32>
    %136 = vector.extract_strided_slice %94 {offsets = [6, 0], sizes = [1, 32], strides = [1, 1]} : vector<8x32xf32> to vector<1x32xf32>
    %137 = vector.extract_strided_slice %94 {offsets = [7, 0], sizes = [1, 32], strides = [1, 1]} : vector<8x32xf32> to vector<1x32xf32>
    %138 = tpu.concatenate %134, %135, %136, %137 in 1 : vector<1x32xf32>, vector<1x32xf32>, vector<1x32xf32>, vector<1x32xf32> -> vector<1x128xf32>
    %139 = vector.broadcast %138 : vector<1x128xf32> to vector<32x128xf32>
    %140 = arith.addf %133, %139 : vector<32x128xf32>
    %cst_58 = arith.constant 0.000000e+00 : f32
    %141 = vector.broadcast %cst_58 : f32 to vector<32x128xf32>
    %142 = arith.cmpf ogt, %140, %141 : vector<32x128xf32>
    %cst_59 = arith.constant 2.000000e-01 : f32
    %143 = vector.broadcast %cst_59 : f32 to vector<32x128xf32>
    %144 = arith.mulf %143, %140 : vector<32x128xf32>
    %145 = arith.select %142, %140, %144 : vector<32x128xi1>, vector<32x128xf32>
    %cst_60 = arith.constant 0.000000e+00 : f32
    %146 = vector.broadcast %cst_60 : f32 to vector<32x128xf32>
    %147 = arith.cmpf ogt, %1, %146 : vector<32x128xf32>
    %cst_61 = arith.constant -1.000000e+30 : f32
    %148 = vector.broadcast %cst_61 : f32 to vector<32x128xf32>
    %149 = arith.select %147, %145, %148 : vector<32x128xi1>, vector<32x128xf32>
    %cst_62 = arith.constant dense<0xFF800000> : vector<32xf32>
    %150 = vector.multi_reduction <maximumf>, %149, %cst_62 [1] : vector<32x128xf32> to vector<32xf32>
    %151 = vector.shape_cast %150 : vector<32xf32> to vector<32x1xf32>
    %152 = vector.broadcast %151 : vector<32x1xf32> to vector<32x128xf32>
    %153 = arith.subf %149, %152 : vector<32x128xf32>
    %154 = math.exp %153 : vector<32x128xf32>
    %cst_63 = arith.constant dense<0.000000e+00> : vector<32x4xf32>
    %155 = tpu.matmul %154, %96, %cst_63 {dimension_numbers = #tpu.dot_dimension_numbers<[1], [0], [0], [1], [0, 0, 1, 1], [], []>} : vector<32x128xf32>, vector<128x4xf32>, vector<32x4xf32> -> vector<32x4xf32>
    %cst_64 = arith.constant 9.99999968E-21 : f32
    %156 = vector.broadcast %cst_64 : f32 to vector<32x4xf32>
    %157 = arith.maximumf %155, %156 : vector<32x4xf32>
    %cst_65 = arith.constant 1.000000e+00 : f32
    %158 = vector.broadcast %cst_65 : f32 to vector<32x4xf32>
    %159 = arith.divf %158, %157 : vector<32x4xf32>
    %cst_66 = arith.constant dense<0.000000e+00> : vector<32x128xf32>
    %160 = tpu.matmul %159, %95, %cst_66 {dimension_numbers = #tpu.dot_dimension_numbers<[1], [0], [0], [1], [0, 0, 1, 1], [], []>} : vector<32x4xf32>, vector<4x128xf32>, vector<32x128xf32> -> vector<32x128xf32>
    %161 = arith.mulf %154, %160 : vector<32x128xf32>
    %162 = vector.extract_strided_slice %91 {offsets = [0, 64], sizes = [32, 64], strides = [1, 1]} : vector<32x128xf32> to vector<32x64xf32>
    %163 = tpu.concatenate %162, %162, %162, %162 in 0 : vector<32x64xf32>, vector<32x64xf32>, vector<32x64xf32>, vector<32x64xf32> -> vector<128x64xf32>
    %164 = arith.mulf %163, %97 : vector<128x64xf32>
    %cst_67 = arith.constant dense<0.000000e+00> : vector<32x64xf32>
    %165 = tpu.matmul %161, %164, %cst_67 {dimension_numbers = #tpu.dot_dimension_numbers<[1], [0], [0], [1], [0, 0, 1, 1], [], []>} : vector<32x128xf32>, vector<128x64xf32>, vector<32x64xf32> -> vector<32x64xf32>
    %166 = tpu.concatenate %131, %165 in 1 : vector<32x64xf32>, vector<32x64xf32> -> vector<32x128xf32>
    %c0_68 = arith.constant 0 : index
    %c0_69 = arith.constant 0 : index
    %167 = vector.load %arg6[%c0_68, %c0_69] : memref<1x128xf32, #tpu.memory_space<vmem>>, vector<1x128xf32>
    %168 = vector.broadcast %167 : vector<1x128xf32> to vector<32x128xf32>
    %169 = arith.addf %166, %168 : vector<32x128xf32>
    %cst_70 = arith.constant 0.000000e+00 : f32
    %170 = vector.broadcast %cst_70 : f32 to vector<32x128xf32>
    %171 = arith.cmpf ogt, %169, %170 : vector<32x128xf32>
    %cst_71 = arith.constant 0.00999999977 : f32
    %172 = vector.broadcast %cst_71 : f32 to vector<32x128xf32>
    %173 = arith.mulf %172, %169 : vector<32x128xf32>
    %174 = arith.select %171, %169, %173 : vector<32x128xi1>, vector<32x128xf32>
    %c0_72 = arith.constant 0 : index
    %c0_73 = arith.constant 0 : index
    %175 = vector.load %arg7[%c0_72, %c0_73] : memref<128x256xf32, #tpu.memory_space<vmem>>, vector<128x256xf32>
    %cst_74 = arith.constant dense<0.000000e+00> : vector<32x256xf32>
    %176 = tpu.matmul %174, %175, %cst_74 {dimension_numbers = #tpu.dot_dimension_numbers<[1], [0], [0], [1], [0, 0, 1, 1], [], []>} : vector<32x128xf32>, vector<128x256xf32>, vector<32x256xf32> -> vector<32x256xf32>
    %177 = vector.extract_strided_slice %176 {offsets = [0, 0], sizes = [32, 128], strides = [1, 1]} : vector<32x256xf32> to vector<32x128xf32>
    %178 = vector.extract_strided_slice %176 {offsets = [0, 129], sizes = [32, 1], strides = [1, 1]} : vector<32x256xf32> to vector<32x1xf32>
    %179 = vector.extract_strided_slice %176 {offsets = [0, 128], sizes = [32, 8], strides = [1, 1]} : vector<32x256xf32> to vector<32x8xf32>
    %180 = tpu.transpose %179, [1, 0] : vector<32x8xf32> -> vector<8x32xf32>
    %181 = vector.extract_strided_slice %180 {offsets = [0, 0], sizes = [1, 32], strides = [1, 1]} : vector<8x32xf32> to vector<1x32xf32>
    %182 = vector.broadcast %178 : vector<32x1xf32> to vector<32x32xf32>
    %183 = vector.broadcast %181 : vector<1x32xf32> to vector<32x32xf32>
    %184 = arith.addf %182, %183 : vector<32x32xf32>
    %cst_75 = arith.constant 0.000000e+00 : f32
    %185 = vector.broadcast %cst_75 : f32 to vector<32x32xf32>
    %186 = arith.cmpf ogt, %184, %185 : vector<32x32xf32>
    %cst_76 = arith.constant 2.000000e-01 : f32
    %187 = vector.broadcast %cst_76 : f32 to vector<32x32xf32>
    %188 = arith.mulf %187, %184 : vector<32x32xf32>
    %189 = arith.select %186, %184, %188 : vector<32x32xi1>, vector<32x32xf32>
    %cst_77 = arith.constant 0.000000e+00 : f32
    %190 = vector.broadcast %cst_77 : f32 to vector<32x32xf32>
    %191 = arith.cmpf ogt, %0, %190 : vector<32x32xf32>
    %cst_78 = arith.constant -1.000000e+30 : f32
    %192 = vector.broadcast %cst_78 : f32 to vector<32x32xf32>
    %193 = arith.select %191, %189, %192 : vector<32x32xi1>, vector<32x32xf32>
    %cst_79 = arith.constant dense<0xFF800000> : vector<32xf32>
    %194 = vector.multi_reduction <maximumf>, %193, %cst_79 [1] : vector<32x32xf32> to vector<32xf32>
    %195 = vector.shape_cast %194 : vector<32xf32> to vector<32x1xf32>
    %196 = vector.broadcast %195 : vector<32x1xf32> to vector<32x32xf32>
    %197 = arith.subf %193, %196 : vector<32x32xf32>
    %198 = math.exp %197 : vector<32x32xf32>
    %cst_80 = arith.constant dense<0.000000e+00> : vector<32xf32>
    %199 = vector.multi_reduction <add>, %198, %cst_80 [1] : vector<32x32xf32> to vector<32xf32>
    %200 = vector.shape_cast %199 : vector<32xf32> to vector<32x1xf32>
    %cst_81 = arith.constant 9.99999968E-21 : f32
    %201 = vector.broadcast %cst_81 : f32 to vector<32x1xf32>
    %202 = arith.maximumf %200, %201 : vector<32x1xf32>
    %cst_82 = arith.constant 1.000000e+00 : f32
    %203 = vector.broadcast %cst_82 : f32 to vector<32x1xf32>
    %204 = arith.divf %203, %202 : vector<32x1xf32>
    %205 = vector.broadcast %204 : vector<32x1xf32> to vector<32x32xf32>
    %206 = arith.mulf %198, %205 : vector<32x32xf32>
    %cst_83 = arith.constant dense<0.000000e+00> : vector<32x128xf32>
    %207 = tpu.matmul %206, %177, %cst_83 {dimension_numbers = #tpu.dot_dimension_numbers<[1], [0], [0], [1], [0, 0, 1, 1], [], []>} : vector<32x32xf32>, vector<32x128xf32>, vector<32x128xf32> -> vector<32x128xf32>
    %c0_84 = arith.constant 0 : index
    %c0_85 = arith.constant 0 : index
    %208 = vector.load %arg8[%c0_84, %c0_85] : memref<1x128xf32, #tpu.memory_space<vmem>>, vector<1x128xf32>
    %209 = vector.broadcast %208 : vector<1x128xf32> to vector<32x128xf32>
    %210 = arith.addf %207, %209 : vector<32x128xf32>
    %c0_86 = arith.constant 0 : index
    %c0_87 = arith.constant 0 : index
    %211 = vector.load %arg12[%c0_86, %c0_87] : memref<32x128xf32, #tpu.memory_space<vmem>>, vector<32x128xf32>
    tpu.vector_store %arg12[%c0_86, %c0_87], %210 {strides = array<i32>} : memref<32x128xf32, #tpu.memory_space<vmem>>, vector<32x128xf32>,
    return
  }
  func.func @transform_0(%arg0: i32) -> (i32, i32) {
    %c0_i32 = arith.constant 0 : i32
    %c0_i32_0 = arith.constant 0 : i32
    %c0_i32_1 = arith.constant 0 : i32
    return %c0_i32, %c0_i32_0 : i32, i32
  }
  func.func @transform_1(%arg0: i32) -> (i32, i32) {
    %c0_i32 = arith.constant 0 : i32
    %c0_i32_0 = arith.constant 0 : i32
    %c0_i32_1 = arith.constant 0 : i32
    return %c0_i32, %c0_i32_0 : i32, i32
  }
  func.func @transform_2(%arg0: i32) -> (i32, i32) {
    %c0_i32 = arith.constant 0 : i32
    %c0_i32_0 = arith.constant 0 : i32
    %c0_i32_1 = arith.constant 0 : i32
    return %c0_i32, %c0_i32_0 : i32, i32
  }
  func.func @transform_3(%arg0: i32) -> (i32, i32) {
    %c0_i32 = arith.constant 0 : i32
    %c0_i32_0 = arith.constant 0 : i32
    %c0_i32_1 = arith.constant 0 : i32
    return %c0_i32, %c0_i32_0 : i32, i32
  }
  func.func @transform_4(%arg0: i32) -> (i32, i32) {
    %c0_i32 = arith.constant 0 : i32
    %c0_i32_0 = arith.constant 0 : i32
    %c0_i32_1 = arith.constant 0 : i32
    return %c0_i32, %c0_i32_0 : i32, i32
  }
  func.func @transform_5(%arg0: i32) -> (i32, i32) {
    %c0_i32 = arith.constant 0 : i32
    %c0_i32_0 = arith.constant 0 : i32
    %c0_i32_1 = arith.constant 0 : i32
    return %c0_i32, %c0_i32_0 : i32, i32
  }
  func.func @transform_6(%arg0: i32) -> (i32, i32) {
    %c0_i32 = arith.constant 0 : i32
    %c0_i32_0 = arith.constant 0 : i32
    %c0_i32_1 = arith.constant 0 : i32
    return %c0_i32, %c0_i32_0 : i32, i32
  }
  func.func @transform_7(%arg0: i32) -> (i32, i32) {
    %c0_i32 = arith.constant 0 : i32
    %c0_i32_0 = arith.constant 0 : i32
    %c0_i32_1 = arith.constant 0 : i32
    return %c0_i32, %c0_i32_0 : i32, i32
  }
  func.func @transform_8(%arg0: i32) -> (i32, i32) {
    %c0_i32 = arith.constant 0 : i32
    %c0_i32_0 = arith.constant 0 : i32
    %c0_i32_1 = arith.constant 0 : i32
    return %c0_i32, %c0_i32_0 : i32, i32
  }
  func.func @transform_9(%arg0: i32) -> (i32, i32) {
    %c0_i32 = arith.constant 0 : i32
    %c0_i32_0 = arith.constant 0 : i32
    %c0_i32_1 = arith.constant 0 : i32
    return %c0_i32, %c0_i32_0 : i32, i32
  }
  func.func @transform_10(%arg0: i32) -> (i32, i32) {
    %c0_i32 = arith.constant 0 : i32
    %c0_i32_0 = arith.constant 0 : i32
    %c0_i32_1 = arith.constant 0 : i32
    return %c0_i32, %c0_i32_0 : i32, i32
  }
  func.func @transform_11(%arg0: i32) -> (i32, i32) {
    %c0_i32 = arith.constant 0 : i32
    %c0_i32_0 = arith.constant 0 : i32
    %c0_i32_1 = arith.constant 0 : i32
    return %c0_i32, %c0_i32_0 : i32, i32
  }
}

</mosaic_0001>

<bundles_post_ra>
// kernel: tpu_custom_call.1
= control target key start
LH: loop header
LB: loop body
LE: loop exit
PB: predicated region body
PF: predicated region fallthrough
CT: control target
= control target key end

     0   :  { %16 = vsyncpa [#allocation3], 0  ;;  %s5303_s0 = inlined_call_operand.vmem [shape: f32[32,8], index: 0, kind: input, shape index: {}]   ;;  %s5304_s1 = inlined_call_operand.vmem [shape: f32[32,32], index: 1, kind: input, shape index: {}]   ;;  %s5305_s2 = inlined_call_operand.vmem [shape: f32[8,256], index: 2, kind: input, shape index: {}]   ;;  %s5306_s3 = inlined_call_operand.vmem [shape: f32[1,128], index: 3, kind: input, shape index: {}]   ;;  %s5307_s4 = inlined_call_operand.vmem [shape: f32[128,256], index: 4, kind: input, shape index: {}]   ;;  %s5308_s5 = inlined_call_operand.vmem [shape: f32[1,128], index: 5, kind: input, shape index: {}]   ;;  %s5309_s6 = inlined_call_operand.hbm [shape: f32[128,256], index: 6, kind: input, shape index: {}]   ;;  %s5310_s7 = inlined_call_operand.vmem [shape: f32[1,128], index: 7, kind: input, shape index: {}]   ;;  %s5311_s8 = inlined_call_operand.vmem [shape: f32[4,128], index: 8, kind: input, shape index: {}]   ;;  %s5312_s9 = inlined_call_operand.vmem [shape: f32[128,4], index: 9, kind: input, shape index: {}]   ;;  %s5313_s10 = inlined_call_operand.vmem [shape: f32[128,64], index: 10, kind: input, shape index: {}]   ;;  %s5314_s11 = inlined_call_operand.hbm [shape: f32[32,128], index: 11, kind: output, shape index: {}]  }
   0x1   :  { %17 = vsyncpa [#allocation4], 0  ;;  %s4116_s17 = smov [#allocation2]   ;;  %s4068_s21 = scalar_lea.hbm %s5309_s6, 4096 }
   0x2   :  { %s35_s18 = sshll.u32 %s4116_s17, 4  ;;  %p4069_p0 = scmp.ne.s32.totalorder %s5309_s6, %s4068_s21  ;;  %s36_s18 = int_to_ptr.vmem [resolvable:$true] %s35_s18 }
   0x3   :  { %p4072_p1 = scmp.lt.u32.totalorder %s4068_s21, %s5309_s6 }
   0x5   :  { %p4074_p2 = pnand %p4072_p1, %p4069_p0 }
   0x7   :  { %4077 = shalt.err (!%p4074_p2)
}
   0x8   :  { %s4078_s26 = scalar_lea.vmem %s36_s18, 4096  ;;  %p4083_p4 = scmp.lt.s32.totalorder %s36_s18, %s36_s18 }
   0x9   :  { %p4079_p3 = scmp.ne.s32.totalorder %s36_s18, %s4078_s26  ;;  %p4084_p5 = scmp.lt.s32.totalorder %s4078_s26, %s4078_s26 }
   0xb   :  { %p4085_p6 = por %p4084_p5, %p4083_p4 }
   0xd   :  { %p4086_p7 = pnand %p4085_p6, %p4079_p3 }
   0xf   :  { %4089 = shalt.err (!%p4086_p7)
}
  0x10   :  { %s4117_s27 = smov 256   ;;  %s4118_s28 = smov 16  }
  0x11   :  { %41 = dma.hbm_to_vmem [thread:$0]  %s5309_s6, 4096, %s36_s18, [#allocation3], %s4117_s27, %s4117_s27, %s4118_s28  }
  0x12   :  { %4112 = dma.done.wait [#allocation3], 4096  }
  0x13   :  { %4113 = vsyncadd [#allocation3], 4294963200  ;;  %v5315_v0 = vmov 0.0   ;;  %v117_v1 = vld [vmem:[%s5305_s2 + $0x8] sm:$0xff]  ;;  %v116_v2 = vld [vmem:[%s5305_s2] sm:$0xff]  ;;  %vm118_vm0 = vcmask 64512  }
  0x14   :  { %195 = vmatprep.mubr.f32.mxu0 %v5315_v0  ;;  %v112_v3 = vld [vmem:[%s5303_s0] sm:$0xff]  ;;  %131 = vmatprep.subr.mxu0 %v117_v1  ;;  %v113_v4 = vld [vmem:[%s5303_s0 + $0x8] sm:$0xff]  ;;  %v114_v5 = vld [vmem:[%s5303_s0 + $0x10] sm:$0xff]  ;;  %vm326_vm1 = vcmask 1043456   ;;  %s4120_s14 = smov 120   ;;  %s4121_s6 = smov 32  }
  0x15   :  { %132 = vmatpush1.msra.mxu0 %v116_v2  ;;  %v115_v6 = vld [vmem:[%s5303_s0 + $0x18] sm:$0xff]  ;;  %v4226_v7 = vld [vmem:[%s5311_s8] sm:$0xf]  ;;  %v4251_v12 = vld [vmem:[%s5313_s10 + $0x8] sm:$0xff]  ;;  %s4122_s20 = smov 64   ;;  %s4123_s2 = smov 96  }
  0x16   :  { %2903 = vmatmul.mubr.msk.f32.vlgmr.msra.gmra.mrb[0].mxu0 %vm118_vm0, %v112_v3  ;;  %3162 = vmatprep.subr.msk.mxu1 %vm326_vm1, %v4226_v7  ;;  %v4239_v9 = vld [vmem:[%s5313_s10] sm:$0xff]  ;;  %v4268_v15 = vld [vmem:[%s5313_s10 + $0x28] sm:$0xff]  ;;  %v4315_v33 = vld [vmem:[%s5313_s10 + $0x10] sm:$0xff]  ;;  %vm317_vm2 = vcmask 31744   ;;  %vm97_vm3 = vcmask 261120   ;;  %vm102_vm4 = vcmask 523264  }
  0x17   :  { %201 = vmatprep.mubr.f32.mxu0 %v5315_v0  ;;  %3163 = vmatpush3.msk.msra.mxu1 %vm326_vm1, %v4226_v7  ;;  %v4244_v10 = vld [vmem:[%s5313_s10 + $0x20] sm:$0xff]  ;;  %v4273_v16 = vld [vmem:[%s5313_s10 + $0x48] sm:$0xff]  ;;  %v4320_v34 = vld [vmem:[%s5313_s10 + $0x30] sm:$0xff]  ;;  %vm107_vm5 = vcmask 785408   ;;  %s4124_s16 = smov 116   ;;  %s4126_s28 = smov [#allocation5]  }
  0x18   :  { %3208 = vmatprep.subr.msk.mxu1 %vm326_vm1, %v4226_v7  ;;  %v4256_v13 = vld [vmem:[%s5313_s10 + $0x40] sm:$0xff]  ;;  %v4278_v17 = vld [vmem:[%s5313_s10 + $0x68] sm:$0xff]  ;;  %v4327_v36 = vld [vmem:[%s5313_s10 + $0x18] sm:$0xff]  ;;  %s2891_s29 = sshll.u32 %s4126_s28, 4  ;;  %s2892_s29 = int_to_ptr.vmem [resolvable:$true] %s2891_s29 }
  0x19   :  { %v4261_v14 = vld [vmem:[%s5313_s10 + $0x60] sm:$0xff]  ;;  %v4332_v37 = vld [vmem:[%s5313_s10 + $0x50] sm:$0xff]  ;;  %v4344_v39 = vld [vmem:[%s5313_s10 + $0x38] sm:$0xff]  ;;  %s4090_s30 = scalar_lea.vmem %s2892_s29, 512  ;;  %p4095_p9 = scmp.lt.s32.totalorder %s2892_s29, %s2892_s29 }
  0x1a   :  { %2904 = vmatmul.mubr.msk.f32.gmra.mrb[2].mxu0 %vm118_vm0, %v113_v4  ;;  %v4337_v38 = vld [vmem:[%s5313_s10 + $0x70] sm:$0xff]  ;;  %v4349_v40 = vld [vmem:[%s5313_s10 + $0x58] sm:$0xff]  ;;  %v4381_v52 = vld [vmem:[%s5304_s1] sm:$0xff]  ;;  %p4091_p8 = scmp.ne.s32.totalorder %s2892_s29, %s4090_s30  ;;  %p4096_p10 = scmp.lt.s32.totalorder %s4090_s30, %s4090_s30 }
  0x1b   :  { %207 = vmatprep.mubr.f32.mxu0 %v5315_v0  ;;  %v4354_v41 = vld [vmem:[%s5313_s10 + $0x78] sm:$0xff]  ;;  %v4396_v57 = vld [vmem:[%s5304_s1 + $0x8] sm:$0xff]  ;;  %v4412_v58 = vld [vmem:[%s5304_s1 + $0x10] sm:$0xff] }
  0x1c   :  { %v4420_v59 = vld [vmem:[%s5304_s1 + $0x18] sm:$0xff]  ;;  %p4097_p11 = por %p4096_p10, %p4095_p9 }
  0x1e   :  { %2905 = vmatmul.mubr.msk.f32.gmra.mrb[4].mxu0 %vm118_vm0, %v114_v5  ;;  %v253_v5 = vld [vmem:[%s5312_s9] sm:$0xff]  ;;  %p4098_p12 = pnand %p4097_p11, %p4091_p8 }
  0x1f   :  { %213 = vmatprep.mubr.f32.mxu0 %v5315_v0 }
  0x22   :  { %2906 = vmatmul.mubr.msk.f32.gmra.mrb[6].mxu0 %vm118_vm0, %v115_v6  ;;  %v254_v6 = vld [vmem:[%s5312_s9 + $0x8] sm:$0xff] }
  0xe9   :  { %v4234_v8 = vpop.f32.mrb[0].mxu0 }
  0xea   :  { %v4246_v11 = vpop.f32.mrb[1].mxu0  ;;  %v653_v19 = vmul.f32 %v4239_v9, %v4234_v8  ;;  %v657_v20 = vmul.f32 %v4244_v10, %v4234_v8  ;;  %v661_v21 = vmul.f32 %v4256_v13, %v4234_v8  ;;  %v665_v22 = vmul.f32 %v4261_v14, %v4234_v8 }
  0xeb   :  { %309 = vrot.lane.b32.xlu0 %v4246_v11, %s4120_s14 }
  0xed   :  { %v4280_v18 = vpop.f32.mrb[2].mxu0 }
  0xee   :  { %v4290_v23 = vpop.f32.mrb[3].mxu0  ;;  %v654_v24 = vmul.f32 %v4251_v12, %v4280_v18  ;;  %v658_v25 = vmul.f32 %v4268_v15, %v4280_v18  ;;  %v662_v26 = vmul.f32 %v4273_v16, %v4280_v18  ;;  %v666_v27 = vmul.f32 %v4278_v17, %v4280_v18 }
  0xef   :  { %311 = vrot.lane.b32.xlu0 %v4290_v23, %s4120_s14 }
  0xf0   :  { %v4302_v28 = vpack.c.bf16 %v654_v24, %v653_v19  ;;  %v4304_v29 = vpack.c.bf16 %v658_v25, %v657_v20  ;;  %v4306_v30 = vpack.c.bf16 %v662_v26, %v661_v21  ;;  %v4308_v31 = vpack.c.bf16 %v666_v27, %v665_v22  ;;  %v255_v19 = vld [vmem:[%s5312_s9 + $0x10] sm:$0xff]  ;;  %v256_v21 = vld [vmem:[%s5312_s9 + $0x18] sm:$0xff]  ;;  %v257_v24 = vld [vmem:[%s5312_s9 + $0x20] sm:$0xff] }
  0xf1   :  { %v4310_v32 = vpop.f32.mrb[4].mxu0  ;;  %v4453_v20 = vpack.c.bf16 %v254_v6, %v253_v5  ;;  %v4458_v22 = vpack.c.bf16 %v256_v21, %v255_v19  ;;  %v258_v25 = vld [vmem:[%s5312_s9 + $0x28] sm:$0xff]  ;;  %v259_v27 = vld [vmem:[%s5312_s9 + $0x30] sm:$0xff] }
  0xf2   :  { %5319 = vst [vmem:[#allocation8_spill] sm:$0xff] %v4310_v32  ;;  %v4322_v35 = vpop.f32.mrb[5].mxu0  ;;  %v655_v43 = vmul.f32 %v4315_v33, %v4310_v32  ;;  %v659_v44 = vmul.f32 %v4320_v34, %v4310_v32  ;;  %v663_v45 = vmul.f32 %v4332_v37, %v4310_v32  ;;  %v667_v46 = vmul.f32 %v4337_v38, %v4310_v32 }
  0xf3   :  { %313 = vrot.lane.b32.xlu1 %v4322_v35, %s4120_s14  ;;  %3545 = vmatprep.subr.bf16.mxu0 %v4453_v20  ;;  %v4469_v26 = vpack.c.bf16 %v258_v25, %v257_v24 }
  0xf4   :  { %3547 = vmatpush3.bf16.msra.mxu0 %v4453_v20 }
  0xf5   :  { %v4356_v42 = vpop.f32.mrb[6].mxu0  ;;  %3549 = vmatprep.subr.bf16.mxu0 %v4458_v22 }
  0xf6   :  { %v4366_v47 = vpop.f32.mrb[7].mxu0  ;;  %v656_v48 = vmul.f32 %v4327_v36, %v4356_v42  ;;  %v660_v49 = vmul.f32 %v4344_v39, %v4356_v42  ;;  %v664_v50 = vmul.f32 %v4349_v40, %v4356_v42  ;;  %v668_v51 = vmul.f32 %v4354_v41, %v4356_v42 }
  0xf7   :  { %315 = vrot.lane.b32.xlu1 %v4366_v47, %s4120_s14 }
  0xf8   :  { %v4383_v53 = vpack.c.bf16 %v656_v48, %v655_v43  ;;  %v4385_v54 = vpack.c.bf16 %v660_v49, %v659_v44  ;;  %v4387_v55 = vpack.c.bf16 %v664_v50, %v663_v45  ;;  %v4389_v56 = vpack.c.bf16 %v668_v51, %v667_v46  ;;  %v260_v43 = vld [vmem:[%s5312_s9 + $0x38] sm:$0xff]  ;;  %3551 = vmatpush3.bf16.msra.mxu0 %v4458_v22 }
  0xf9   :  { %3553 = vmatprep.subr.bf16.mxu0 %v4469_v26  ;;  %v4479_v44 = vpack.c.bf16 %v260_v43, %v259_v27 }
  0xfb   :  { %61 = vrot.lane.b32.xlu1 %v4381_v52, %s4121_s6 }
  0xfc   :  { %3555 = vmatpush3.bf16.msra.mxu0 %v4469_v26 }
  0xfd   :  { %3557 = vmatprep.subr.bf16.mxu0 %v4479_v44 }
  0xff   :  { %63 = vrot.lane.b32.xlu1 %v4396_v57, %s4121_s6 }
 0x100   :  { %3559 = vmatpush3.bf16.msra.mxu0 %v4479_v44 }
 0x103   :  { %73 = vrot.lane.b32.xlu1 %v4381_v52, %s4122_s20 }
 0x107   :  { %75 = vrot.lane.b32.xlu1 %v4396_v57, %s4122_s20 }
 0x10b   :  { %85 = vrot.lane.b32.xlu1 %v4381_v52, %s4123_s2 }
 0x10d   :  { %220 = vxpose.xlu0.b32.start [1/4] (short) (narrow) %v4246_v11, 8 }
 0x10f   :  { %87 = vrot.lane.b32.xlu1 %v4396_v57, %s4123_s2 }
 0x111   :  { %221 = vxpose.xlu0.b32.cont [2/4] (short) (narrow) %v4290_v23, 8 }
 0x113   :  { %65 = vrot.lane.b32.xlu1 %v4412_v58, %s4121_s6 }
 0x115   :  { %222 = vxpose.xlu0.b32.cont [3/4] (short) (narrow) %v4322_v35, 8 }
 0x117   :  { %67 = vrot.lane.b32.xlu1 %v4420_v59, %s4121_s6 }
 0x119   :  { %223 = vxpose.xlu0.b32.end [4/4] (short) (narrow) %v4366_v47, 8 }
 0x142   :  { %77 = vrot.lane.b32.xlu0 %v4412_v58, %s4122_s20 }
 0x15d   :  { %v310_v60 = vpop.permute.xlu0 %309 }
 0x15e   :  { %3164 = vmatprep.mubr.msk.f32.mxu1 %vm317_vm2, %v310_v60 }
 0x161   :  { %v312_v61 = vpop.permute.xlu0 %311 }
 0x162   :  { %3165 = vmatmul.mubr.msk.f32.vlgmr.msra.gmra.mrb[0].mxu1 %vm317_vm2, %v312_v61 }
 0x163   :  { %3209 = vmatpush3.msk.msra.mxu1 %vm326_vm1, %v4226_v7 }
 0x164   :  { %3577 = vmatprep.subr.bf16.mxu1 %v4302_v28 }
 0x165   :  { %v314_v62 = vpop.permute.xlu1 %313 }
 0x166   :  { %3167 = vmatprep.mubr.msk.f32.mxu1 %vm317_vm2, %v314_v62 }
 0x169   :  { %v316_v63 = vpop.permute.xlu1 %315 }
 0x16a   :  { %3168 = vmatmul.mubr.msk.f32.gmra.mrb[2].mxu1 %vm317_vm2, %v316_v63 }
 0x16d   :  { %v62_v45 = vpop.permute.xlu1 %61 }
 0x16e   :  { %v98_v27 = vsel %vm97_vm3, %v4381_v52, %v62_v45 }
 0x171   :  { %v64_v46 = vpop.permute.xlu1 %63 }
 0x172   :  { %v99_v24 = vsel %vm97_vm3, %v4396_v57, %v64_v46 }
 0x175   :  { %v74_v48 = vpop.permute.xlu1 %73 }
 0x179   :  { %v76_v49 = vpop.permute.xlu1 %75 }
 0x17a   :  { %v104_v43 = vsel %vm102_vm4, %v99_v24, %v76_v49 }
 0x17d   :  { %v86_v50 = vpop.permute.xlu1 %85 }
 0x181   :  { %v88_v51 = vpop.permute.xlu1 %87 }
 0x182   :  { %v4503_v32 = vsel %vm107_vm5, %v104_v43, %v88_v51 }
 0x183   :  { %vm428_vm8 = vcmp.gt.f32.partialorder %v4503_v32, 0.0 }
 0x185   :  { %v66_v60 = vpop.permute.xlu1 %65 }
 0x189   :  { %v68_v61 = vpop.permute.xlu1 %67 }
 0x18a   :  { %v101_v52 = vsel %vm97_vm3, %v4420_v59, %v68_v61 }
 0x18d   :  { %v236_v1 = vpop.trf.xlu0 }
 0x18e   :  { %v286_v2 = vrot.slane %v236_v1, 1  ;;  %v290_v3 = vrot.slane %v236_v1, 2  ;;  %v294_v4 = vrot.slane %v236_v1, 3 }
 0x190   :  { %287 = vrot.lane.b32.xlu1 %v286_v2, %s4121_s6  ;;  %v301_v2 = vlaneseq }
 0x194   :  { %291 = vrot.lane.b32.xlu1 %v290_v3, %s4122_s20  ;;  %v4484_v3 = vshrl.u32 %v301_v2, 7 }
 0x196   :  { %v4489_v19 = vsub.s32 0, %v4484_v3 }
 0x198   :  { %295 = vrot.lane.b32.xlu1 %v294_v4, %s4123_s2 }
 0x19c   :  { %79 = vrot.lane.b32.xlu1 %v4420_v59, %s4122_s20 }
 0x1a0   :  { %89 = vrot.lane.b32.xlu1 %v4412_v58, %s4123_s2 }
 0x1a4   :  { %91 = vrot.lane.b32.xlu1 %v4420_v59, %s4123_s2  ;;  %v100_v59 = vsel %vm97_vm3, %v4412_v58, %v66_v60 }
 0x1b4   :  { %v78_v61 = vpop.permute.xlu0 %77 }
 0x202   :  { %v288_v62 = vpop.permute.xlu1 %287 }
 0x203   :  { %v298_v5 = vsel %vm97_vm3, %v236_v1, %v288_v62  ;;  %v103_v62 = vsel %vm102_vm4, %v98_v27, %v74_v48 }
 0x204   :  { %v4506_v46 = vsel %vm107_vm5, %v103_v62, %v86_v50 }
 0x205   :  { %vm427_vm9 = vcmp.gt.f32.partialorder %v4506_v46, 0.0 }
 0x206   :  { %v292_v63 = vpop.permute.xlu1 %291 }
 0x207   :  { %v299_v6 = vsel %vm102_vm4, %v298_v5, %v292_v63 }
 0x20a   :  { %v296_v4 = vpop.permute.xlu1 %295 }
 0x20b   :  { %v4494_v25 = vsel %vm107_vm5, %v299_v6, %v296_v4 }
 0x20c   :  { %v304_v1 = vrot.slane %v4494_v25, %v4489_v19 }
 0x20e   :  { %v80_v21 = vpop.permute.xlu1 %79 }
 0x212   :  { %v90_v2 = vpop.permute.xlu1 %89 }
 0x216   :  { %v92_v50 = vpop.permute.xlu1 %91 }
 0x235   :  { %v3166_v63 = vpop.f32.mrb[0].mxu1 }
 0x236   :  { %v402_v5 = vadd.f32 %v3166_v63, %v304_v1  ;;  %v396_v0 = vpop.f32.mrb[1].mxu1 }
 0x237   :  { %v397_v57 = vadd.f32 %v396_v0, %v304_v1  ;;  %v106_v0 = vsel %vm102_vm4, %v101_v52, %v80_v21 }
 0x238   :  { %v420_v4 = vmul.f32 0.2, %v402_v5  ;;  %vm416_vm6 = vcmp.gt.f32.partialorder %v402_v5, 0.0  ;;  %v4520_v62 = vsel %vm107_vm5, %v106_v0, %v92_v50  ;;  %v264_v0 = vld [vmem:[%s5312_s9 + $0x58] sm:$0xff] }
 0x239   :  { %v419_v45 = vmul.f32 0.2, %v397_v57  ;;  %vm415_vm7 = vcmp.gt.f32.partialorder %v397_v57, 0.0  ;;  %vm430_vm12 = vcmp.gt.f32.partialorder %v4520_v62, 0.0 }
 0x23a   :  { %v424_v48 = vsel %vm416_vm6, %v402_v5, %v420_v4  ;;  %v105_v5 = vsel %vm102_vm4, %v100_v59, %v78_v61  ;;  %v265_v59 = vld [vmem:[%s5312_s9 + $0x60] sm:$0xff]  ;;  %v266_v61 = vld [vmem:[%s5312_s9 + $0x68] sm:$0xff] }
 0x23b   :  { %v432_v49 = vsel %vm428_vm8, %v424_v48, -1e+30  ;;  %v423_v51 = vsel %vm415_vm7, %v397_v57, %v419_v45  ;;  %v4525_v58 = vsel %vm107_vm5, %v105_v5, %v90_v2  ;;  %v261_v45 = vld [vmem:[%s5312_s9 + $0x40] sm:$0xff]  ;;  %v262_v2 = vld [vmem:[%s5312_s9 + $0x48] sm:$0xff] }
 0x23c   :  { %437 = vmax.xlane.f32.xlu0 %v432_v49  ;;  %v431_v6 = vsel %vm427_vm9, %v423_v51, -1e+30  ;;  %vm429_vm13 = vcmp.gt.f32.partialorder %v4525_v58, 0.0  ;;  %v4538_v48 = vpack.c.bf16 %v262_v2, %v261_v45  ;;  %v263_v51 = vld [vmem:[%s5312_s9 + $0x50] sm:$0xff] }
 0x23d   :  { %v3169_v24 = vpop.f32.mrb[2].mxu1  ;;  %435 = vmax.xlane.f32.xlu1 %v431_v6  ;;  %v4548_v50 = vpack.c.bf16 %v264_v0, %v263_v51 }
 0x23e   :  { %v412_v27 = vadd.f32 %v3169_v24, %v304_v1  ;;  %v406_v43 = vpop.f32.mrb[3].mxu1  ;;  %3561 = vmatprep.subr.bf16.mxu0 %v4538_v48  ;;  %v4560_v24 = vpack.c.bf16 %v266_v61, %v265_v59 }
 0x23f   :  { %v407_v63 = vadd.f32 %v406_v43, %v304_v1  ;;  %3563 = vmatpush3.bf16.msra.mxu0 %v4538_v48  ;;  %v268_v43 = vld [vmem:[%s5312_s9 + $0x78] sm:$0xff] }
 0x240   :  { %v422_v21 = vmul.f32 0.2, %v412_v27  ;;  %vm418_vm10 = vcmp.gt.f32.partialorder %v412_v27, 0.0  ;;  %3565 = vmatprep.subr.bf16.mxu0 %v4548_v50 }
 0x241   :  { %v421_v57 = vmul.f32 0.2, %v407_v63  ;;  %vm417_vm11 = vcmp.gt.f32.partialorder %v407_v63, 0.0 }
 0x242   :  { %v426_v4 = vsel %vm418_vm10, %v412_v27, %v422_v21  ;;  %v267_v27 = vld [vmem:[%s5312_s9 + $0x70] sm:$0xff] }
 0x243   :  { %v434_v60 = vsel %vm430_vm12, %v426_v4, -1e+30  ;;  %v425_v52 = vsel %vm417_vm11, %v407_v63, %v421_v57  ;;  %3567 = vmatpush3.bf16.msra.mxu0 %v4548_v50  ;;  %v4570_v63 = vpack.c.bf16 %v268_v43, %v267_v27 }
 0x244   :  { %441 = vmax.xlane.f32.xlu1 %v434_v60  ;;  %v433_v1 = vsel %vm429_vm13, %v425_v52, -1e+30  ;;  %3569 = vmatprep.subr.bf16.mxu0 %v4560_v24 }
 0x247   :  { %3571 = vmatpush3.bf16.msra.mxu0 %v4560_v24 }
 0x248   :  { %439 = vmax.xlane.f32.xlu1 %v433_v1  ;;  %3573 = vmatprep.subr.bf16.mxu0 %v4570_v63 }
 0x24b   :  { %3575 = vmatpush3.bf16.msra.mxu0 %v4570_v63 }
 0x24c   :  { %3254 = vmatprep.subr.msk.mxu0 %vm326_vm1, %v4226_v7 }
 0x252   :  { %760 = vrot.lane.b32.xlu0 %v4290_v23, %s4124_s16 }
 0x259   :  { %758 = vrot.lane.b32.xlu1 %v4246_v11, %s4124_s16 }
 0x25d   :  { %762 = vrot.lane.b32.xlu1 %v4322_v35, %s4124_s16 }
 0x261   :  { %764 = vrot.lane.b32.xlu1 %v4366_v47, %s4124_s16 }
 0x2c9   :  { %v438_v23 = vpop.xlane.xlu0 %437 }
 0x2ca   :  { %v444_v5 = vsub.f32 %v432_v49, %v438_v23  ;;  %v436_v21 = vpop.xlane.xlu1 %435 }
 0x2cb   :  { %v443_v57 = vsub.f32 %v431_v6, %v436_v21 }
 0x2cc   :  { %v449_v4 = vmul.f32 1.442695, %v444_v5 }
 0x2cd   :  { %v447_v52 = vmul.f32 1.442695, %v443_v57  ;;  %v756_v57 = vsub.s32 4, %v4484_v3 }
 0x2cf   :  { %3967 = vpow2.f32 %v447_v52 }
 0x2d0   :  { %3969 = vpow2.f32 %v449_v4 }
 0x2d1   :  { %v442_v11 = vpop.xlane.xlu1 %441 }
 0x2d2   :  { %v446_v45 = vsub.f32 %v434_v60, %v442_v11 }
 0x2d4   :  { %v453_v0 = vmul.f32 1.442695, %v446_v45 }
 0x2d5   :  { %v440_v2 = vpop.xlane.xlu1 %439 }
 0x2d6   :  { %v445_v51 = vsub.f32 %v433_v1, %v440_v2  ;;  %v761_v1 = vpop.permute.xlu0 %760 }
 0x2d8   :  { %v451_v59 = vmul.f32 1.442695, %v445_v51  ;;  %v757_v51 = vrot.slane %v4494_v25, %v756_v57 }
 0x2d9   :  { %v4582_v61 = vpop.eup %3967  ;;  %v759_v47 = vpop.permute.xlu1 %758 }
 0x2da   :  { %v4584_v35 = vpop.eup %3969  ;;  %3971 = vpow2.f32 %v451_v59  ;;  %3202 = vmatprep.mubr.f32.mxu0 %v4582_v61 }
 0x2db   :  { %3973 = vpow2.f32 %v453_v0  ;;  %3203 = vmatmul.mubr.f32.vlgmr.msra.gmra.mrb[8].mxu0 %v4584_v35 }
 0x2dc   :  { %3255 = vmatpush3.msk.msra.mxu0 %vm326_vm1, %v4226_v7 }
 0x2dd   :  { %3609 = vmatprep.subr.bf16.mxu0 %v4453_v20  ;;  %v763_v60 = vpop.permute.xlu1 %762 }
 0x2e1   :  { %v765_v27 = vpop.permute.xlu1 %764 }
 0x2e4   :  { %v4591_v49 = vpop.eup %3971 }
 0x2e5   :  { %v4593_v6 = vpop.eup %3973  ;;  %3205 = vmatprep.mubr.f32.mxu0 %v4591_v49 }
 0x2e6   :  { %3206 = vmatmul.mubr.f32.gmra.mrb[10].mxu0 %v4593_v6 }
 0x2e7   :  { %3256 = vmatprep.mubr.msk.f32.mxu0 %vm317_vm2, %v759_v47 }
 0x2ea   :  { %3257 = vmatmul.mubr.msk.f32.vlgmr.msra.gmra.mrb[12].mxu0 %vm317_vm2, %v761_v1 }
 0x2eb   :  { %3259 = vmatprep.mubr.msk.f32.mxu0 %vm317_vm2, %v763_v60  ;;  %3611 = vmatpush3.bf16.msra.mxu0 %v4453_v20 }
 0x2ec   :  { %3613 = vmatprep.subr.bf16.mxu0 %v4458_v22 }
 0x2ee   :  { %3260 = vmatmul.mubr.msk.f32.gmra.mrb[14].mxu0 %vm317_vm2, %v765_v27 }
 0x2ef   :  { %3615 = vmatpush3.bf16.msra.mxu0 %v4458_v22 }
 0x2f0   :  { %3617 = vmatprep.subr.bf16.mxu0 %v4469_v26 }
 0x2f3   :  { %3619 = vmatpush3.bf16.msra.mxu0 %v4469_v26 }
 0x2f4   :  { %3621 = vmatprep.subr.bf16.mxu0 %v4479_v44 }
 0x2f7   :  { %3623 = vmatpush3.bf16.msra.mxu0 %v4479_v44 }
 0x2f8   :  { %3625 = vmatprep.subr.bf16.mxu0 %v4538_v48 }
 0x2fb   :  { %3627 = vmatpush3.bf16.msra.mxu0 %v4538_v48 }
 0x2fc   :  { %3629 = vmatprep.subr.bf16.mxu0 %v4548_v50 }
 0x2ff   :  { %3631 = vmatpush3.bf16.msra.mxu0 %v4548_v50 }
 0x300   :  { %3633 = vmatprep.subr.bf16.mxu0 %v4560_v24 }
 0x303   :  { %3635 = vmatpush3.bf16.msra.mxu0 %v4560_v24 }
 0x304   :  { %3637 = vmatprep.subr.bf16.mxu0 %v4570_v63 }
 0x307   :  { %3639 = vmatpush3.bf16.msra.mxu0 %v4570_v63 }
 0x3ae   :  { %v3204_v43 = vpop.f32.mrb[8].mxu0 }
 0x3af   :  { %v541_v23 = vmax.f32 %v3204_v43, 1e-20  ;;  %v521_v5 = vpop.f32.mrb[9].mxu0 }
 0x3b0   :  { %v540_v21 = vmax.f32 %v521_v5, 1e-20 }
 0x3b2   :  { %3975 = vrcp.f32 %v540_v21 }
 0x3b3   :  { %3977 = vrcp.f32 %v541_v23 }
 0x3b9   :  { %v3207_v4 = vpop.f32.mrb[10].mxu0 }
 0x3ba   :  { %v543_v52 = vmax.f32 %v3207_v4, 1e-20  ;;  %v531_v11 = vpop.f32.mrb[11].mxu0 }
 0x3bb   :  { %v542_v45 = vmax.f32 %v531_v11, 1e-20 }
 0x3bc   :  { %v3976_v2 = vpop.eup %3975 }
 0x3bd   :  { %v3978_v0 = vpop.eup %3977  ;;  %3979 = vrcp.f32 %v542_v45  ;;  %3210 = vmatprep.mubr.msk.f32.mxu1 %vm317_vm2, %v3976_v2  ;;  %v3258_v59 = vpop.f32.mrb[12].mxu0 }
 0x3be   :  { %3981 = vrcp.f32 %v543_v52  ;;  %v846_v47 = vadd.f32 %v3258_v59, %v757_v51  ;;  %3211 = vmatmul.mubr.msk.f32.vlgmr.msra.gmra.mrb[4].mxu1 %vm317_vm2, %v3978_v0  ;;  %v840_v60 = vpop.f32.mrb[13].mxu0 }
 0x3bf   :  { %3579 = vmatpush3.bf16.msra.mxu1 %v4302_v28  ;;  %v841_v1 = vadd.f32 %v840_v60, %v757_v51 }
 0x3c0   :  { %v864_v27 = vmul.f32 0.2, %v846_v47  ;;  %3581 = vmatprep.subr.bf16.mxu1 %v4383_v53  ;;  %vm860_vm14 = vcmp.gt.f32.partialorder %v846_v47, 0.0 }
 0x3c1   :  { %v863_v43 = vmul.f32 0.2, %v841_v1  ;;  %v3261_v23 = vpop.f32.mrb[14].mxu0  ;;  %vm859_vm15 = vcmp.gt.f32.partialorder %v841_v1, 0.0 }
 0x3c2   :  { %v856_v25 = vadd.f32 %v3261_v23, %v757_v51  ;;  %v850_v5 = vpop.f32.mrb[15].mxu0  ;;  %v868_v21 = vsel %vm860_vm14, %v846_v47, %v864_v27 }
 0x3c3   :  { %3583 = vmatpush3.bf16.msra.mxu1 %v4383_v53  ;;  %v851_v4 = vadd.f32 %v850_v5, %v757_v51  ;;  %v872_v52 = vsel %vm428_vm8, %v868_v21, -1e+30  ;;  %v867_v11 = vsel %vm859_vm15, %v841_v1, %v863_v43  ;;  %v5320_v43 = vld [vmem:[#allocation8_spill] sm:$0xff] }
 0x3c4   :  { %3585 = vmatprep.subr.bf16.mxu1 %v4304_v29  ;;  %877 = vmax.xlane.f32.xlu0 %v872_v52  ;;  %v871_v28 = vsel %vm427_vm9, %v867_v11, -1e+30  ;;  %v866_v45 = vmul.f32 0.2, %v856_v25  ;;  %vm862_vm6 = vcmp.gt.f32.partialorder %v856_v25, 0.0 }
 0x3c5   :  { %v865_v2 = vmul.f32 0.2, %v851_v4  ;;  %875 = vmax.xlane.f32.xlu1 %v871_v28  ;;  %vm861_vm0 = vcmp.gt.f32.partialorder %v851_v4, 0.0 }
 0x3c6   :  { %v870_v47 = vsel %vm862_vm6, %v856_v25, %v866_v45 }
 0x3c7   :  { %v3980_v0 = vpop.eup %3979  ;;  %3587 = vmatpush3.bf16.msra.mxu1 %v4304_v29  ;;  %v869_v53 = vsel %vm861_vm0, %v851_v4, %v865_v2  ;;  %v874_v29 = vsel %vm430_vm12, %v870_v47, -1e+30 }
 0x3c8   :  { %v3982_v51 = vpop.eup %3981  ;;  %3589 = vmatprep.subr.bf16.mxu1 %v4385_v54  ;;  %3213 = vmatprep.mubr.msk.f32.mxu1 %vm317_vm2, %v3980_v0  ;;  %v873_v59 = vsel %vm429_vm13, %v869_v53, -1e+30 }
 0x3c9   :  { %3214 = vmatmul.mubr.msk.f32.gmra.mrb[6].mxu1 %vm317_vm2, %v3982_v51  ;;  %879 = vmax.xlane.f32.xlu1 %v873_v59  ;;  %v5321_v51 = vmov 0.0  }
 0x3cb   :  { %3591 = vmatpush3.bf16.msra.mxu1 %v4385_v54 }
 0x3cc   :  { %3593 = vmatprep.subr.bf16.mxu1 %v4306_v30 }
 0x3cd   :  { %881 = vmax.xlane.f32.xlu1 %v874_v29 }
 0x3cf   :  { %3595 = vmatpush3.bf16.msra.mxu1 %v4306_v30 }
 0x3d0   :  { %3597 = vmatprep.subr.bf16.mxu1 %v4387_v55 }
 0x3d3   :  { %3599 = vmatpush3.bf16.msra.mxu1 %v4387_v55 }
 0x3d4   :  { %3601 = vmatprep.subr.bf16.mxu1 %v4308_v31 }
 0x3d7   :  { %3603 = vmatpush3.bf16.msra.mxu1 %v4308_v31 }
 0x3d8   :  { %3605 = vmatprep.subr.bf16.mxu1 %v4389_v56 }
 0x3da   :  { %1109 = vrot.lane.b32.xlu0 %v4239_v9, %s4122_s20 }
 0x3db   :  { %3607 = vmatpush3.bf16.msra.mxu1 %v4389_v56 }
 0x3dc   :  { %3300 = vmatprep.subr.msk.mxu1 %vm326_vm1, %v4226_v7 }
 0x3de   :  { %1115 = vrot.lane.b32.xlu0 %v4327_v36, %s4122_s20  ;;  %1111 = vrot.lane.b32.xlu1 %v4251_v12, %s4122_s20 }
 0x3e2   :  { %1119 = vrot.lane.b32.xlu0 %v4268_v15, %s4122_s20  ;;  %1113 = vrot.lane.b32.xlu1 %v4315_v33, %s4122_s20 }
 0x3e6   :  { %1123 = vrot.lane.b32.xlu0 %v4344_v39, %s4122_s20  ;;  %1117 = vrot.lane.b32.xlu1 %v4244_v10, %s4122_s20 }
 0x3ea   :  { %1127 = vrot.lane.b32.xlu0 %v4273_v16, %s4122_s20  ;;  %1121 = vrot.lane.b32.xlu1 %v4320_v34, %s4122_s20 }
 0x3ee   :  { %1131 = vrot.lane.b32.xlu0 %v4349_v40, %s4122_s20  ;;  %1125 = vrot.lane.b32.xlu1 %v4256_v13, %s4122_s20 }
 0x3f2   :  { %1135 = vrot.lane.b32.xlu0 %v4278_v17, %s4122_s20  ;;  %1129 = vrot.lane.b32.xlu1 %v4332_v37, %s4122_s20 }
 0x3f6   :  { %1139 = vrot.lane.b32.xlu0 %v4354_v41, %s4122_s20  ;;  %1133 = vrot.lane.b32.xlu1 %v4261_v14, %s4122_s20 }
 0x3fa   :  { %1137 = vrot.lane.b32.xlu1 %v4337_v38, %s4122_s20 }
 0x451   :  { %v878_v9 = vpop.xlane.xlu0 %877 }
 0x452   :  { %v884_v10 = vsub.f32 %v872_v52, %v878_v9  ;;  %v876_v12 = vpop.xlane.xlu1 %875 }
 0x453   :  { %v883_v15 = vsub.f32 %v871_v28, %v876_v12 }
 0x454   :  { %v889_v13 = vmul.f32 1.442695, %v884_v10 }
 0x455   :  { %v887_v16 = vmul.f32 1.442695, %v883_v15  ;;  %v4681_v30 = vpop.permute.xlu0 %1109 }
 0x456   :  { %v880_v17 = vpop.xlane.xlu1 %879  ;;  %v1157_v40 = vmul.f32 %v4681_v30, %v4234_v8 }
 0x457   :  { %3983 = vpow2.f32 %v887_v16  ;;  %v885_v31 = vsub.f32 %v873_v59, %v880_v17 }
 0x458   :  { %3985 = vpow2.f32 %v889_v13 }
 0x459   :  { %v891_v33 = vmul.f32 1.442695, %v885_v31  ;;  %v4683_v34 = vpop.permute.xlu0 %1115 }
 0x45a   :  { %v882_v36 = vpop.xlane.xlu1 %881  ;;  %v1160_v27 = vmul.f32 %v4683_v34, %v4356_v42 }
 0x45b   :  { %3987 = vpow2.f32 %v891_v33  ;;  %v886_v14 = vsub.f32 %v874_v29, %v882_v36 }
 0x45d   :  { %v893_v37 = vmul.f32 1.442695, %v886_v14  ;;  %v4685_v38 = vpop.permute.xlu0 %1119 }
 0x45e   :  { %v4687_v39 = vpop.permute.xlu1 %1111  ;;  %v1162_v52 = vmul.f32 %v4685_v38, %v4280_v18 }
 0x45f   :  { %3989 = vpow2.f32 %v893_v37  ;;  %v1158_v41 = vmul.f32 %v4687_v39, %v4280_v18 }
 0x461   :  { %v4693_v54 = vpop.eup %3983  ;;  %v3885_v55 = vpack.i.bf16 %v1158_v41, %v1157_v40  ;;  %v4695_v56 = vpop.permute.xlu0 %1123 }
 0x462   :  { %v4697_v60 = vpop.eup %3985  ;;  %3294 = vmatprep.mubr.f32.mxu0 %v4693_v54  ;;  %v4700_v1 = vpop.permute.xlu1 %1113  ;;  %v1164_v0 = vmul.f32 %v4695_v56, %v4356_v42 }
 0x463   :  { %v1159_v23 = vmul.f32 %v4700_v1, %v5320_v43  ;;  %3295 = vmatmul.mubr.f32.vlgmr.msra.gmra.mrb[16].mxu0 %v4697_v60  ;;  %3886 = vrot.lane.b32.xlu1 %v3885_v55, %s4122_s20 }
 0x465   :  { %v4708_v25 = vpop.eup %3987  ;;  %v3890_v5 = vpack.i.bf16 %v1160_v27, %v1159_v23  ;;  %v4710_v21 = vpop.permute.xlu0 %1127 }
 0x466   :  { %3297 = vmatprep.mubr.f32.mxu0 %v4708_v25  ;;  %v4713_v4 = vpop.permute.xlu1 %1117  ;;  %v1166_v9 = vmul.f32 %v4710_v21, %v4280_v18 }
 0x467   :  { %v1161_v11 = vmul.f32 %v4713_v4, %v4234_v8  ;;  %3891 = vrot.lane.b32.xlu0 %v3890_v5, %s4122_s20 }
 0x469   :  { %v4720_v28 = vpop.eup %3989  ;;  %v3895_v45 = vpack.i.bf16 %v1162_v52, %v1161_v11  ;;  %v4731_v59 = vpop.permute.xlu0 %1131 }
 0x46a   :  { %3298 = vmatmul.mubr.f32.gmra.mrb[18].mxu0 %v4720_v28  ;;  %v4723_v2 = vpop.permute.xlu1 %1121  ;;  %v1168_v16 = vmul.f32 %v4731_v59, %v4356_v42 }
 0x46b   :  { %v1163_v53 = vmul.f32 %v4723_v2, %v5320_v43  ;;  %3896 = vrot.lane.b32.xlu1 %v3895_v45, %s4122_s20  ;;  %1461 = vmatprep.mubr.f32.mxu0 %v5321_v51 }
 0x46d   :  { %v3900_v47 = vpack.i.bf16 %v1164_v0, %v1163_v53  ;;  %v4740_v15 = vpop.permute.xlu0 %1135 }
 0x46e   :  { %v4733_v29 = vpop.permute.xlu1 %1125  ;;  %v1170_v36 = vmul.f32 %v4740_v15, %v4280_v18 }
 0x46f   :  { %v1165_v10 = vmul.f32 %v4733_v29, %v4234_v8  ;;  %3901 = vrot.lane.b32.xlu0 %v3900_v47, %s4122_s20 }
 0x471   :  { %v3905_v12 = vpack.i.bf16 %v1166_v9, %v1165_v10  ;;  %v4756_v37 = vpop.permute.xlu0 %1139 }
 0x472   :  { %v4742_v13 = vpop.permute.xlu1 %1129  ;;  %v1172_v55 = vmul.f32 %v4756_v37, %v4356_v42 }
 0x473   :  { %v1167_v17 = vmul.f32 %v4742_v13, %v5320_v43  ;;  %3906 = vrot.lane.b32.xlu1 %v3905_v12, %s4122_s20 }
 0x475   :  { %v3910_v31 = vpack.i.bf16 %v1168_v16, %v1167_v17 }
 0x476   :  { %v4749_v33 = vpop.permute.xlu1 %1133 }
 0x477   :  { %v1169_v14 = vmul.f32 %v4749_v33, %v4234_v8  ;;  %3911 = vrot.lane.b32.xlu0 %v3910_v31, %s4122_s20 }
 0x479   :  { %v3915_v40 = vpack.i.bf16 %v1170_v36, %v1169_v14 }
 0x47a   :  { %v4758_v41 = vpop.permute.xlu1 %1137 }
 0x47b   :  { %v1171_v27 = vmul.f32 %v4758_v41, %v5320_v43  ;;  %3916 = vrot.lane.b32.xlu1 %v3915_v40, %s4122_s20 }
 0x47d   :  { %v3920_v23 = vpack.i.bf16 %v1172_v55, %v1171_v27 }
 0x47f   :  { %3921 = vrot.lane.b32.xlu0 %v3920_v23, %s4122_s20 }
 0x491   :  { %v3212_v18 = vpop.f32.mrb[4].mxu1 }
 0x492   :  { %v630_v8 = vpop.f32.mrb[5].mxu1  ;;  %v650_v52 = vmul.f32 %v4584_v35, %v3212_v18 }
 0x493   :  { %v649_v5 = vmul.f32 %v4582_v61, %v630_v8 }
 0x495   :  { %3248 = vmatprep.mubr.f32.mxu1 %v649_v5 }
 0x496   :  { %3249 = vmatmul.mubr.f32.vlgmr.msra.gmra.mrb[8].mxu1 %v650_v52 }
 0x497   :  { %3301 = vmatpush3.msk.msra.mxu1 %vm326_vm1, %v4226_v7 }
 0x49c   :  { %v3215_v42 = vpop.f32.mrb[6].mxu1 }
 0x49d   :  { %v640_v11 = vpop.f32.mrb[7].mxu1  ;;  %v652_v45 = vmul.f32 %v4593_v6, %v3215_v42 }
 0x49e   :  { %v651_v43 = vmul.f32 %v4591_v49, %v640_v11 }
 0x4a0   :  { %3251 = vmatprep.mubr.f32.mxu1 %v651_v43 }
 0x4a1   :  { %3252 = vmatmul.mubr.f32.gmra.mrb[10].mxu1 %v652_v45 }
 0x4d5   :  { %v3887_v0 = vpop.permute.xlu1 %3886 }
 0x4d6   :  { %v3889_v53 = vunpack.i.h.bf16 %v3887_v0  ;;  %v3888_v47 = vunpack.i.l.bf16 %v3887_v0 }
 0x4d8   :  { %v3640_v9 = vpack.c.bf16 %v3889_v53, %v3888_v47 }
 0x4d9   :  { %v3892_v36 = vpop.permute.xlu0 %3891 }
 0x4da   :  { %3641 = vmatprep.subr.bf16.mxu1 %v3640_v9  ;;  %v3894_v6 = vunpack.i.h.bf16 %v3892_v36  ;;  %v3893_v14 = vunpack.i.l.bf16 %v3892_v36 }
 0x4dc   :  { %v3644_v23 = vpack.c.bf16 %v3894_v6, %v3893_v14 }
 0x4dd   :  { %v3897_v40 = vpop.permute.xlu1 %3896 }
 0x4de   :  { %v3899_v18 = vunpack.i.h.bf16 %v3897_v40  ;;  %v3898_v8 = vunpack.i.l.bf16 %v3897_v40 }
 0x4e0   :  { %v3648_v52 = vpack.c.bf16 %v3899_v18, %v3898_v8 }
 0x4e1   :  { %v3902_v5 = vpop.permute.xlu0 %3901 }
 0x4e2   :  { %v3904_v42 = vunpack.i.h.bf16 %v3902_v5  ;;  %v3903_v11 = vunpack.i.l.bf16 %v3902_v5 }
 0x4e4   :  { %v3652_v53 = vpack.c.bf16 %v3904_v42, %v3903_v11 }
 0x4e5   :  { %v3907_v45 = vpop.permute.xlu1 %3906 }
 0x4e6   :  { %v3909_v47 = vunpack.i.h.bf16 %v3907_v45 }
 0x536   :  { %v3296_v61 = vpop.f32.mrb[16].mxu0 }
 0x537   :  { %v981_v35 = vmax.f32 %v3296_v61, 1e-20  ;;  %v961_v10 = vpop.f32.mrb[17].mxu0  ;;  %v3908_v61 = vunpack.i.l.bf16 %v3907_v45 }
 0x538   :  { %v980_v12 = vmax.f32 %v961_v10, 1e-20 }
 0x53a   :  { %3991 = vrcp.f32 %v980_v12 }
 0x53b   :  { %3993 = vrcp.f32 %v981_v35  ;;  %v3912_v35 = vpop.permute.xlu0 %3911 }
 0x53c   :  { %v3914_v10 = vunpack.i.h.bf16 %v3912_v35  ;;  %v3913_v12 = vunpack.i.l.bf16 %v3912_v35 }
 0x53d   :  { %v3299_v16 = vpop.f32.mrb[18].mxu0 }
 0x53e   :  { %v983_v17 = vmax.f32 %v3299_v16, 1e-20  ;;  %v971_v31 = vpop.f32.mrb[19].mxu0  ;;  %v3917_v16 = vpop.permute.xlu1 %3916 }
 0x53f   :  { %v982_v49 = vmax.f32 %v971_v31, 1e-20  ;;  %v3919_v31 = vunpack.i.h.bf16 %v3917_v16  ;;  %v3918_v36 = vunpack.i.l.bf16 %v3917_v16  ;;  %v1374_v16 = vld [vmem:[%s5307_s4 + $0x48] sm:$0xff] }
 0x541   :  { %3995 = vrcp.f32 %v982_v49  ;;  %v3922_v49 = vpop.permute.xlu0 %3921  ;;  %v3664_v6 = vpack.c.bf16 %v3919_v31, %v3918_v36 }
 0x542   :  { %3997 = vrcp.f32 %v983_v17  ;;  %v3660_v17 = vpack.c.bf16 %v3914_v10, %v3913_v12  ;;  %v3924_v14 = vunpack.i.h.bf16 %v3922_v49  ;;  %v3923_v40 = vunpack.i.l.bf16 %v3922_v49  ;;  %v1369_v10 = vld [vmem:[%s5307_s4 + $0x20] sm:$0xff]  ;;  %v1371_v12 = vld [vmem:[%s5307_s4 + $0x30] sm:$0xff] }
 0x543   :  { %v3678_v31 = vpack.c.bf16 %v1371_v12, %v1369_v10  ;;  %v1373_v49 = vld [vmem:[%s5307_s4 + $0x40] sm:$0xff] }
 0x544   :  { %v3992_v55 = vpop.eup %3991 }
 0x545   :  { %v3994_v27 = vpop.eup %3993  ;;  %3302 = vmatprep.mubr.msk.f32.mxu1 %vm317_vm2, %v3992_v55  ;;  %v3668_v55 = vpack.c.bf16 %v3924_v14, %v3923_v40  ;;  %v1378_v14 = vld [vmem:[%s5307_s4 + $0x68] sm:$0xff]  ;;  %v1380_v40 = vld [vmem:[%s5307_s4 + $0x78] sm:$0xff] }
 0x546   :  { %3303 = vmatmul.mubr.msk.f32.vlgmr.msra.gmra.mrb[12].mxu1 %vm317_vm2, %v3994_v27 }
 0x547   :  { %3643 = vmatpush3.bf16.msra.mxu1 %v3640_v9  ;;  %v3656_v9 = vpack.c.bf16 %v3909_v47, %v3908_v61  ;;  %v1372_v61 = vld [vmem:[%s5307_s4 + $0x38] sm:$0xff] }
 0x548   :  { %3645 = vmatprep.subr.bf16.mxu1 %v3644_v23 }
 0x54b   :  { %v3996_v43 = vpop.eup %3995  ;;  %3647 = vmatpush3.bf16.msra.mxu1 %v3644_v23 }
 0x54c   :  { %v3998_v0 = vpop.eup %3997  ;;  %3649 = vmatprep.subr.bf16.mxu1 %v3648_v52  ;;  %3305 = vmatprep.mubr.msk.f32.mxu1 %vm317_vm2, %v3996_v43 }
 0x54d   :  { %3306 = vmatmul.mubr.msk.f32.gmra.mrb[14].mxu1 %vm317_vm2, %v3998_v0 }
 0x54f   :  { %3651 = vmatpush3.bf16.msra.mxu1 %v3648_v52 }
 0x550   :  { %3653 = vmatprep.subr.bf16.mxu1 %v3652_v53 }
 0x553   :  { %3655 = vmatpush3.bf16.msra.mxu1 %v3652_v53 }
 0x554   :  { %3657 = vmatprep.subr.bf16.mxu1 %v3656_v9 }
 0x557   :  { %3659 = vmatpush3.bf16.msra.mxu1 %v3656_v9 }
 0x558   :  { %3661 = vmatprep.subr.bf16.mxu1 %v3660_v17 }
 0x55b   :  { %3663 = vmatpush3.bf16.msra.mxu1 %v3660_v17  ;;  %v1376_v17 = vld [vmem:[%s5307_s4 + $0x58] sm:$0xff] }
 0x55c   :  { %3665 = vmatprep.subr.bf16.mxu1 %v3664_v6  ;;  %v3680_v36 = vpack.c.bf16 %v1376_v17, %v1374_v16  ;;  %v1389_v16 = vld [vmem:[%s5307_s4 + $0xc0] sm:$0xff]  ;;  %v1391_v17 = vld [vmem:[%s5307_s4 + $0xd0] sm:$0xff] }
 0x55f   :  { %3667 = vmatpush3.bf16.msra.mxu1 %v3664_v6  ;;  %v1375_v6 = vld [vmem:[%s5307_s4 + $0x50] sm:$0xff] }
 0x560   :  { %3669 = vmatprep.subr.bf16.mxu1 %v3668_v55 }
 0x563   :  { %3671 = vmatpush3.bf16.msra.mxu1 %v3668_v55  ;;  %v3682_v55 = vpack.c.bf16 %v1375_v6, %v1373_v49  ;;  %v1396_v49 = vld [vmem:[%s5307_s4 + $0xf8] sm:$0xff] }
 0x564   :  { %3346 = vmatprep.subr.msk.mxu1 %vm326_vm1, %v4226_v7 }
 0x569   :  { %v4778_v27 = vpop.f32.mrb[8].mxu1 }
 0x56a   :  { %v4780_v23 = vpop.f32.mrb[9].mxu1 }
 0x574   :  { %v4782_v18 = vpop.f32.mrb[10].mxu1 }
 0x575   :  { %v4784_v8 = vpop.f32.mrb[11].mxu1 }
 0x619   :  { %v3304_v5 = vpop.f32.mrb[12].mxu1 }
 0x61a   :  { %v1070_v52 = vpop.f32.mrb[13].mxu1  ;;  %v1090_v11 = vmul.f32 %v4697_v60, %v3304_v5  ;;  %v1368_v60 = vld [vmem:[%s5307_s4 + $0x18] sm:$0xff]  ;;  %v3684_v5 = vpack.c.bf16 %v1380_v40, %v1378_v14  ;;  %v1393_v14 = vld [vmem:[%s5307_s4 + $0xe0] sm:$0xff]  ;;  %v1395_v40 = vld [vmem:[%s5307_s4 + $0xf0] sm:$0xff] }
 0x61b   :  { %v1089_v42 = vmul.f32 %v4693_v54, %v1070_v52  ;;  %v1366_v54 = vld [vmem:[%s5307_s4 + $0x8] sm:$0xff]  ;;  %v1377_v52 = vld [vmem:[%s5307_s4 + $0x60] sm:$0xff] }
 0x61c   :  { %v3672_v47 = vpack.c.bf16 %v1368_v60, %v1366_v54  ;;  %v1383_v54 = vld [vmem:[%s5307_s4 + $0x90] sm:$0xff]  ;;  %v1386_v60 = vld [vmem:[%s5307_s4 + $0xa8] sm:$0xff] }
 0x61d   :  { %3340 = vmatprep.mubr.f32.mxu1 %v1089_v42  ;;  %v1379_v42 = vld [vmem:[%s5307_s4 + $0x70] sm:$0xff] }
 0x61e   :  { %3341 = vmatmul.mubr.f32.vlgmr.msra.gmra.mrb[16].mxu1 %v1090_v11  ;;  %3673 = vmatprep.subr.bf16.mxu0 %v3672_v47  ;;  %v1382_v11 = vld [vmem:[%s5307_s4 + $0x88] sm:$0xff] }
 0x61f   :  { %3347 = vmatpush3.msk.msra.mxu1 %vm326_vm1, %v4226_v7  ;;  %v1365_v7 = vld [vmem:[%s5307_s4] sm:$0xff] }
 0x620   :  { %v3307_v43 = vpop.f32.mrb[14].mxu1  ;;  %3705 = vmatprep.subr.bf16.mxu1 %v4453_v20 }
 0x621   :  { %v1080_v45 = vpop.f32.mrb[15].mxu1  ;;  %v1092_v53 = vmul.f32 %v4720_v28, %v3307_v43  ;;  %v1370_v28 = vld [vmem:[%s5307_s4 + $0x28] sm:$0xff]  ;;  %v1384_v43 = vld [vmem:[%s5307_s4 + $0x98] sm:$0xff] }
 0x622   :  { %v1091_v0 = vmul.f32 %v4708_v25, %v1080_v45  ;;  %v1367_v25 = vld [vmem:[%s5307_s4 + $0x10] sm:$0xff]  ;;  %v3676_v9 = vpack.c.bf16 %v1372_v61, %v1370_v28  ;;  %v3686_v45 = vpack.c.bf16 %v1379_v42, %v1377_v52  ;;  %v1385_v28 = vld [vmem:[%s5307_s4 + $0xa0] sm:$0xff] }
 0x623   :  { %v3674_v35 = vpack.c.bf16 %v1367_v25, %v1365_v7  ;;  %v1388_v7 = vld [vmem:[%s5307_s4 + $0xb8] sm:$0xff]  ;;  %v1387_v61 = vld [vmem:[%s5307_s4 + $0xb0] sm:$0xff] }
 0x624   :  { %3343 = vmatprep.mubr.f32.mxu1 %v1091_v0  ;;  %v3688_v0 = vpack.c.bf16 %v1384_v43, %v1382_v11  ;;  %v3692_v25 = vpack.c.bf16 %v1388_v7, %v1386_v60  ;;  %v3694_v10 = vpack.c.bf16 %v1387_v61, %v1385_v28 }
 0x625   :  { %3344 = vmatmul.mubr.f32.gmra.mrb[18].mxu1 %v1092_v53  ;;  %3675 = vmatpush1.bf16.msra.mxu0 %v3674_v35  ;;  %v1381_v53 = vld [vmem:[%s5307_s4 + $0x80] sm:$0xff]  ;;  %v1390_v35 = vld [vmem:[%s5307_s4 + $0xc8] sm:$0xff] }
 0x626   :  { %3677 = vmatprep.subr.bf16.mxu0 %v3676_v9  ;;  %v3690_v47 = vpack.c.bf16 %v1383_v54, %v1381_v53  ;;  %v1392_v9 = vld [vmem:[%s5307_s4 + $0xd8] sm:$0xff] }
 0x627   :  { %v3696_v12 = vpack.c.bf16 %v1392_v9, %v1390_v35 }
 0x629   :  { %3679 = vmatpush1.bf16.msra.mxu0 %v3678_v31  ;;  %v3698_v31 = vpack.c.bf16 %v1391_v17, %v1389_v16 }
 0x62a   :  { %3681 = vmatprep.subr.bf16.mxu0 %v3680_v36  ;;  %v1394_v36 = vld [vmem:[%s5307_s4 + $0xe8] sm:$0xff] }
 0x62b   :  { %v3700_v6 = vpack.c.bf16 %v1396_v49, %v1394_v36 }
 0x62d   :  { %3683 = vmatpush1.bf16.msra.mxu0 %v3682_v55  ;;  %v3702_v55 = vpack.c.bf16 %v1395_v40, %v1393_v14  ;;  %v4049_v40 = vld [vmem:[%s5313_s10 + $0x20] sm:$0xff] }
 0x62e   :  { %3685 = vmatprep.subr.bf16.mxu0 %v3684_v5  ;;  %v4892_v5 = vld [vmem:[%s5311_s8] sm:$0xf] }
 0x631   :  { %3687 = vmatpush1.bf16.msra.mxu0 %v3686_v45  ;;  %v2927_v45 = vld [vmem:[%s5306_s3] ss:$0 sm:$0xff] }
 0x632   :  { %3689 = vmatprep.subr.bf16.mxu0 %v3688_v0 }
 0x635   :  { %3691 = vmatpush1.bf16.msra.mxu0 %v3690_v47 }
 0x636   :  { %3693 = vmatprep.subr.bf16.mxu0 %v3692_v25 }
 0x639   :  { %3695 = vmatpush1.bf16.msra.mxu0 %v3694_v10 }
 0x63a   :  { %3697 = vmatprep.subr.bf16.mxu0 %v3696_v12 }
 0x63d   :  { %3699 = vmatpush1.bf16.msra.mxu0 %v3698_v31 }
 0x63e   :  { %3701 = vmatprep.subr.bf16.mxu0 %v3700_v6  ;;  %v4048_v6 = vld [vmem:[%s5313_s10] sm:$0xff] }
 0x641   :  { %3703 = vmatpush1.bf16.msra.mxu0 %v3702_v55 }
 0x642   :  { %3392 = vmatprep.subr.msk.mxu0 %vm326_vm1, %v4892_v5 }
 0x6f1   :  { %v3342_v52 = vpop.f32.mrb[16].mxu1 }
 0x6f2   :  { %1328 = vrot.lane.b32.xlu0 %v3342_v52, %s4122_s20  ;;  %v1303_v42 = vpop.f32.mrb[17].mxu1  ;;  %v4050_v52 = vld [vmem:[%s5313_s10 + $0x40] sm:$0xff] }
 0x6f3   :  { %1326 = vrot.lane.b32.xlu1 %v1303_v42, %s4122_s20 }
 0x6f8   :  { %v3345_v11 = vpop.f32.mrb[18].mxu1 }
 0x6f9   :  { %1332 = vrot.lane.b32.xlu0 %v3345_v11, %s4122_s20  ;;  %v1313_v43 = vpop.f32.mrb[19].mxu1  ;;  %v4051_v11 = vld [vmem:[%s5313_s10 + $0x60] sm:$0xff] }
 0x6fa   :  { %1330 = vrot.lane.b32.xlu1 %v1313_v43, %s4122_s20 }
 0x764   :  { %v1329_v0 = vpop.permute.xlu0 %1328 }
 0x765   :  { %v1339_v53 = vsel %vm102_vm4, %v4778_v27, %v1329_v0  ;;  %v1327_v54 = vpop.permute.xlu1 %1326 }
 0x766   :  { %v1338_v60 = vsel %vm102_vm4, %v4780_v23, %v1327_v54  ;;  %v1350_v7 = vadd.f32 %v2927_v45, %v1339_v53 }
 0x767   :  { %v1349_v47 = vadd.f32 %v2927_v45, %v1338_v60 }
 0x768   :  { %v1358_v35 = vmul.f32 0.01, %v1350_v7  ;;  %vm1354_vm10 = vcmp.gt.f32.partialorder %v1350_v7, 0.0 }
 0x769   :  { %vm1353_vm7 = vcmp.gt.f32.partialorder %v1349_v47, 0.0  ;;  %v1357_v25 = vmul.f32 0.01, %v1349_v47 }
 0x76a   :  { %v1362_v16 = vsel %vm1354_vm10, %v1350_v7, %v1358_v35 }
 0x76b   :  { %v1333_v28 = vpop.permute.xlu0 %1332  ;;  %v1361_v61 = vsel %vm1353_vm7, %v1349_v47, %v1357_v25  ;;  %v4052_v47 = vld [vmem:[%s5313_s10 + $0x8] sm:$0xff] }
 0x76c   :  { %v1341_v9 = vsel %vm102_vm4, %v4782_v18, %v1333_v28  ;;  %1462 = vmatmul.mubr.f32.vlgmr.msra.gmra.mrb[20].mxu0 %v1361_v61  ;;  %v1331_v10 = vpop.permute.xlu1 %1330 }
 0x76d   :  { %v1340_v27 = vsel %vm102_vm4, %v4784_v8, %v1331_v10  ;;  %1467 = vmatprep.mubr.f32.mxu0 %v5321_v51  ;;  %3393 = vmatpush3.msk.msra.mxu0 %vm326_vm1, %v4892_v5  ;;  %v1352_v12 = vadd.f32 %v2927_v45, %v1341_v9 }
 0x76e   :  { %v1351_v23 = vadd.f32 %v2927_v45, %v1340_v27 }
 0x76f   :  { %v1360_v31 = vmul.f32 0.01, %v1352_v12  ;;  %vm1356_vm14 = vcmp.gt.f32.partialorder %v1352_v12, 0.0 }
 0x770   :  { %1468 = vmatmul.mubr.f32.gmra.mrb[22].mxu0 %v1362_v16  ;;  %vm1355_vm11 = vcmp.gt.f32.partialorder %v1351_v23, 0.0  ;;  %v1359_v17 = vmul.f32 0.01, %v1351_v23 }
 0x771   :  { %1473 = vmatprep.mubr.f32.mxu0 %v5321_v51  ;;  %v1364_v8 = vsel %vm1356_vm14, %v1352_v12, %v1360_v31 }
 0x772   :  { %v1363_v18 = vsel %vm1355_vm11, %v1351_v23, %v1359_v17 }
 0x774   :  { %1474 = vmatmul.mubr.f32.gmra.mrb[24].mxu0 %v1363_v18 }
 0x775   :  { %1479 = vmatprep.mubr.f32.mxu0 %v5321_v51 }
 0x778   :  { %1480 = vmatmul.mubr.f32.gmra.mrb[26].mxu0 %v1364_v8  ;;  %v4056_v8 = vld [vmem:[%s5313_s10 + $0x10] sm:$0xff] }
 0x83f   :  { %v1463_v36 = vpop.f32.mrb[20].mxu0 }
 0x840   :  { %v4916_v49 = vpop.f32.mrb[21].mxu0  ;;  %v1877_v14 = vmul.f32 %v4048_v6, %v1463_v36  ;;  %v1881_v55 = vmul.f32 %v4049_v40, %v1463_v36  ;;  %v1885_v42 = vmul.f32 %v4050_v52, %v1463_v36  ;;  %v1889_v43 = vmul.f32 %v4051_v11, %v1463_v36  ;;  %v4057_v6 = vld [vmem:[%s5313_s10 + $0x30] sm:$0xff] }
 0x841   :  { %1542 = vrot.lane.b32.xlu1 %v4916_v49, %s4120_s14  ;;  %v4933_v0 = vmul.f32 %v1463_v36, %v4681_v30  ;;  %v4936_v53 = vmul.f32 %v1463_v36, %v4713_v4  ;;  %v4939_v54 = vmul.f32 %v1463_v36, %v4733_v29  ;;  %v4942_v60 = vmul.f32 %v1463_v36, %v4749_v33  ;;  %v4053_v30 = vld [vmem:[%s5313_s10 + $0x28] sm:$0xff]  ;;  %v4058_v40 = vld [vmem:[%s5313_s10 + $0x50] sm:$0xff] }
 0x842   :  { %v4054_v4 = vld [vmem:[%s5313_s10 + $0x48] sm:$0xff]  ;;  %v4059_v11 = vld [vmem:[%s5313_s10 + $0x70] sm:$0xff] }
 0x843   :  { %v1469_v45 = vpop.f32.mrb[22].mxu0  ;;  %v4055_v33 = vld [vmem:[%s5313_s10 + $0x68] sm:$0xff] }
 0x844   :  { %v4944_v7 = vpop.f32.mrb[23].mxu0  ;;  %v1878_v25 = vmul.f32 %v4052_v47, %v1469_v45  ;;  %v1882_v28 = vmul.f32 %v4053_v30, %v1469_v45  ;;  %v1886_v29 = vmul.f32 %v4054_v4, %v1469_v45  ;;  %v1890_v61 = vmul.f32 %v4055_v33, %v1469_v45  ;;  %v4061_v4 = vld [vmem:[%s5313_s10 + $0x38] sm:$0xff] }
 0x845   :  { %1544 = vrot.lane.b32.xlu0 %v4944_v7, %s4120_s14  ;;  %v4961_v35 = vmul.f32 %v1469_v45, %v4687_v39  ;;  %v4964_v9 = vmul.f32 %v1469_v45, %v4685_v38  ;;  %v4967_v10 = vmul.f32 %v1469_v45, %v4710_v21  ;;  %v4970_v27 = vmul.f32 %v1469_v45, %v4740_v15  ;;  %v4063_v33 = vld [vmem:[%s5313_s10 + $0x78] sm:$0xff] }
 0x846   :  { %v4972_v23 = vpack.c.bf16 %v1878_v25, %v1877_v14  ;;  %v4974_v12 = vpack.c.bf16 %v1882_v28, %v1881_v55  ;;  %v4976_v16 = vpack.c.bf16 %v1886_v29, %v1885_v42  ;;  %v4978_v17 = vpack.c.bf16 %v1890_v61, %v1889_v43 }
 0x847   :  { %v1475_v18 = vpop.f32.mrb[24].mxu0  ;;  %v3925_v39 = vpack.i.bf16 %v4961_v35, %v4933_v0  ;;  %v5323_v58 = vpack.i.bf16 %v4964_v9, %v4936_v53  ;;  %v5325_v35 = vpack.i.bf16 %v4967_v10, %v4939_v54  ;;  %v5327_v53 = vpack.i.bf16 %v4970_v27, %v4942_v60 }
 0x848   :  { %v4988_v31 = vpop.f32.mrb[25].mxu0  ;;  %3737 = vmatprep.subr.bf16.mxu0 %v4972_v23  ;;  %v1879_v36 = vmul.f32 %v4056_v8, %v1475_v18  ;;  %v1883_v14 = vmul.f32 %v4057_v6, %v1475_v18  ;;  %v1887_v55 = vmul.f32 %v4058_v40, %v1475_v18  ;;  %v5003_v52 = vmul.f32 %v1475_v18, %v4700_v1  ;;  %v4060_v1 = vld [vmem:[%s5313_s10 + $0x18] sm:$0xff] }
 0x849   :  { %1546 = vrot.lane.b32.xlu1 %v4988_v31, %s4120_s14  ;;  %v1891_v43 = vmul.f32 %v4059_v11, %v1475_v18  ;;  %v5009_v45 = vmul.f32 %v1475_v18, %v4758_v41  ;;  %v5012_v47 = vmul.f32 %v1475_v18, %v4723_v2  ;;  %v5015_v25 = vmul.f32 %v1475_v18, %v4742_v13  ;;  %v4062_v2 = vld [vmem:[%s5313_s10 + $0x58] sm:$0xff] }
 0x84b   :  { %v1481_v42 = vpop.f32.mrb[26].mxu0 }
 0x84c   :  { %v5017_v30 = vpop.f32.mrb[27].mxu0  ;;  %v1880_v28 = vmul.f32 %v4060_v1, %v1481_v42  ;;  %v1884_v29 = vmul.f32 %v4061_v4, %v1481_v42  ;;  %v1888_v41 = vmul.f32 %v4062_v2, %v1481_v42  ;;  %v5029_v13 = vmul.f32 %v1481_v42, %v4683_v34 }
 0x84d   :  { %1548 = vrot.lane.b32.xlu0 %v5017_v30, %s4120_s14  ;;  %v1892_v61 = vmul.f32 %v4063_v33, %v1481_v42  ;;  %v5037_v18 = vmul.f32 %v1481_v42, %v4756_v37  ;;  %v5040_v8 = vmul.f32 %v1481_v42, %v4695_v56  ;;  %v5043_v6 = vmul.f32 %v1481_v42, %v4731_v59 }
 0x84e   :  { %v5045_v40 = vpack.c.bf16 %v1880_v28, %v1879_v36  ;;  %v5047_v34 = vpack.c.bf16 %v1884_v29, %v1883_v14  ;;  %v5049_v11 = vpack.c.bf16 %v1888_v41, %v1887_v55  ;;  %v3930_v1 = vpack.i.bf16 %v5029_v13, %v5003_v52 }
 0x84f   :  { %v5053_v4 = vpack.c.bf16 %v1892_v61, %v1891_v43  ;;  %v5322_v62 = vpack.i.bf16 %v5037_v18, %v5009_v45  ;;  %v5324_v0 = vpack.i.bf16 %v5040_v8, %v5012_v47 }
 0x872   :  { %1486 = vxpose.xlu1.b32.start [1/4] (short) (narrow) %v4916_v49, 8 }
 0x876   :  { %1487 = vxpose.xlu1.b32.cont [2/4] (short) (narrow) %v4944_v7, 8 }
 0x87a   :  { %1488 = vxpose.xlu1.b32.cont [3/4] (short) (narrow) %v4988_v31, 8 }
 0x87e   :  { %1489 = vxpose.xlu1.b32.end [4/4] (short) (narrow) %v5017_v30, 8 }
 0x8b3   :  { %v1543_v36 = vpop.permute.xlu1 %1542 }
 0x8b4   :  { %3348 = vmatprep.mubr.msk.f32.mxu1 %vm317_vm2, %v1543_v36 }
 0x8b7   :  { %v1545_v14 = vpop.permute.xlu0 %1544 }
 0x8b8   :  { %3349 = vmatmul.mubr.msk.f32.vlgmr.msra.gmra.mrb[20].mxu1 %vm317_vm2, %v1545_v14 }
 0x8b9   :  { %3707 = vmatpush3.bf16.msra.mxu1 %v4453_v20 }
 0x8ba   :  { %3709 = vmatprep.subr.bf16.mxu1 %v4458_v22 }
 0x8bb   :  { %v1547_v55 = vpop.permute.xlu1 %1546 }
 0x8bc   :  { %3351 = vmatprep.mubr.msk.f32.mxu1 %vm317_vm2, %v1547_v55 }
 0x8bd   :  { %3711 = vmatpush3.bf16.msra.mxu1 %v4458_v22 }
 0x8be   :  { %3713 = vmatprep.subr.bf16.mxu1 %v4469_v26 }
 0x8bf   :  { %v1549_v42 = vpop.permute.xlu0 %1548 }
 0x8c0   :  { %3352 = vmatmul.mubr.msk.f32.gmra.mrb[22].mxu1 %vm317_vm2, %v1549_v42 }
 0x8c1   :  { %3715 = vmatpush3.bf16.msra.mxu1 %v4469_v26 }
 0x8c2   :  { %3717 = vmatprep.subr.bf16.mxu1 %v4479_v44 }
 0x8c5   :  { %3719 = vmatpush3.bf16.msra.mxu1 %v4479_v44 }
 0x8c6   :  { %3721 = vmatprep.subr.bf16.mxu1 %v4538_v48 }
 0x8c9   :  { %3723 = vmatpush3.bf16.msra.mxu1 %v4538_v48 }
 0x8ca   :  { %3725 = vmatprep.subr.bf16.mxu1 %v4548_v50 }
 0x8cd   :  { %3727 = vmatpush3.bf16.msra.mxu1 %v4548_v50 }
 0x8ce   :  { %3729 = vmatprep.subr.bf16.mxu1 %v4560_v24 }
 0x8d1   :  { %3731 = vmatpush3.bf16.msra.mxu1 %v4560_v24 }
 0x8d2   :  { %3733 = vmatprep.subr.bf16.mxu1 %v4570_v63 }
 0x8d5   :  { %3735 = vmatpush3.bf16.msra.mxu1 %v4570_v63 }
 0x8d6   :  { %3438 = vmatprep.subr.msk.mxu1 %vm326_vm1, %v4892_v5 }
 0x8f2   :  { %v1502_v43 = vpop.trf.xlu1 }
 0x8f3   :  { %v1519_v28 = vrot.slane %v1502_v43, 1  ;;  %v1523_v29 = vrot.slane %v1502_v43, 2  ;;  %v1527_v2 = vrot.slane %v1502_v43, 3 }
 0x8f5   :  { %1520 = vrot.lane.b32.xlu0 %v1519_v28, %s4121_s6 }
 0x8f9   :  { %1524 = vrot.lane.b32.xlu0 %v1523_v29, %s4122_s20 }
 0x8fd   :  { %1528 = vrot.lane.b32.xlu0 %v1527_v2, %s4123_s2 }
 0x967   :  { %v1521_v41 = vpop.permute.xlu0 %1520 }
 0x968   :  { %v1531_v36 = vsel %vm97_vm3, %v1502_v43, %v1521_v41 }
 0x96b   :  { %v1525_v33 = vpop.permute.xlu0 %1524 }
 0x96c   :  { %v1532_v14 = vsel %vm102_vm4, %v1531_v36, %v1525_v33 }
 0x96f   :  { %v1529_v61 = vpop.permute.xlu0 %1528 }
 0x970   :  { %v5092_v55 = vsel %vm107_vm5, %v1532_v14, %v1529_v61 }
 0x971   :  { %v1537_v42 = vrot.slane %v5092_v55, %v4489_v19 }
 0x98b   :  { %v3350_v28 = vpop.f32.mrb[20].mxu1 }
 0x98c   :  { %v1630_v15 = vadd.f32 %v3350_v28, %v1537_v42  ;;  %v1624_v59 = vpop.f32.mrb[21].mxu1 }
 0x98d   :  { %v1625_v29 = vadd.f32 %v1624_v59, %v1537_v42 }
 0x98e   :  { %v1648_v21 = vmul.f32 0.2, %v1630_v15  ;;  %vm1644_vm15 = vcmp.gt.f32.partialorder %v1630_v15, 0.0 }
 0x98f   :  { %v1647_v2 = vmul.f32 0.2, %v1625_v29  ;;  %vm1643_vm0 = vcmp.gt.f32.partialorder %v1625_v29, 0.0 }
 0x990   :  { %v1652_v56 = vsel %vm1644_vm15, %v1630_v15, %v1648_v21 }
 0x991   :  { %v1656_v43 = vsel %vm428_vm8, %v1652_v56, -1e+30  ;;  %v1651_v41 = vsel %vm1643_vm0, %v1625_v29, %v1647_v2 }
 0x992   :  { %1661 = vmax.xlane.f32.xlu0 %v1656_v43  ;;  %v1655_v38 = vsel %vm427_vm9, %v1651_v41, -1e+30 }
 0x993   :  { %v3353_v33 = vpop.f32.mrb[22].mxu1 }
 0x994   :  { %v1640_v61 = vadd.f32 %v3353_v33, %v1537_v42  ;;  %v1634_v36 = vpop.f32.mrb[23].mxu1 }
 0x995   :  { %v1635_v14 = vadd.f32 %v1634_v36, %v1537_v42 }
 0x996   :  { %v1650_v28 = vmul.f32 0.2, %v1640_v61  ;;  %1659 = vmax.xlane.f32.xlu0 %v1655_v38  ;;  %vm1646_vm5 = vcmp.gt.f32.partialorder %v1640_v61, 0.0 }
 0x997   :  { %v1649_v59 = vmul.f32 0.2, %v1635_v14  ;;  %vm1645_vm6 = vcmp.gt.f32.partialorder %v1635_v14, 0.0 }
 0x998   :  { %v1654_v37 = vsel %vm1646_vm5, %v1640_v61, %v1650_v28 }
 0x999   :  { %v1658_v21 = vsel %vm430_vm12, %v1654_v37, -1e+30  ;;  %v1653_v15 = vsel %vm1645_vm6, %v1635_v14, %v1649_v59 }
 0x99a   :  { %1665 = vmax.xlane.f32.xlu1 %v1658_v21  ;;  %v1657_v56 = vsel %vm429_vm13, %v1653_v15, -1e+30 }
 0x99b   :  { %1663 = vmax.xlane.f32.xlu0 %v1657_v56 }
 0x9b1   :  { %1982 = vrot.lane.b32.xlu0 %v4916_v49, %s4124_s16 }
 0x9b5   :  { %1984 = vrot.lane.b32.xlu0 %v4944_v7, %s4124_s16 }
 0x9b9   :  { %1986 = vrot.lane.b32.xlu0 %v4988_v31, %s4124_s16 }
 0x9bd   :  { %1988 = vrot.lane.b32.xlu0 %v5017_v30, %s4124_s16 }
 0xa1f   :  { %v1662_v42 = vpop.xlane.xlu0 %1661 }
 0xa20   :  { %v1668_v37 = vsub.f32 %v1656_v43, %v1662_v42 }
 0xa22   :  { %v1673_v41 = vmul.f32 1.442695, %v1668_v37 }
 0xa23   :  { %v1660_v29 = vpop.xlane.xlu0 %1659 }
 0xa24   :  { %v1667_v2 = vsub.f32 %v1655_v38, %v1660_v29 }
 0xa26   :  { %v1671_v33 = vmul.f32 1.442695, %v1667_v2 }
 0xa27   :  { %v1666_v61 = vpop.xlane.xlu1 %1665 }
 0xa28   :  { %3999 = vpow2.f32 %v1671_v33  ;;  %v1670_v36 = vsub.f32 %v1658_v21, %v1666_v61  ;;  %v1664_v14 = vpop.xlane.xlu0 %1663 }
 0xa29   :  { %4001 = vpow2.f32 %v1673_v41  ;;  %v1669_v49 = vsub.f32 %v1657_v56, %v1664_v14 }
 0xa2a   :  { %v1677_v28 = vmul.f32 1.442695, %v1670_v36 }
 0xa2b   :  { %v1675_v7 = vmul.f32 1.442695, %v1669_v49 }
 0xa2c   :  { %v1983_v31 = vpop.permute.xlu0 %1982 }
 0xa2d   :  { %4003 = vpow2.f32 %v1675_v7 }
 0xa2e   :  { %4005 = vpow2.f32 %v1677_v28 }
 0xa30   :  { %v1985_v38 = vpop.permute.xlu0 %1984 }
 0xa32   :  { %v5112_v59 = vpop.eup %3999 }
 0xa33   :  { %v5114_v30 = vpop.eup %4001  ;;  %3386 = vmatprep.mubr.f32.mxu1 %v5112_v59 }
 0xa34   :  { %3387 = vmatmul.mubr.f32.vlgmr.msra.gmra.mrb[24].mxu1 %v5114_v30  ;;  %v1987_v15 = vpop.permute.xlu0 %1986 }
 0xa35   :  { %3439 = vmatpush3.msk.msra.mxu1 %vm326_vm1, %v4892_v5 }
 0xa36   :  { %3769 = vmatprep.subr.bf16.mxu1 %v4453_v20 }
 0xa37   :  { %v5121_v43 = vpop.eup %4003 }
 0xa38   :  { %v5123_v21 = vpop.eup %4005  ;;  %3389 = vmatprep.mubr.f32.mxu1 %v5121_v43  ;;  %v1989_v56 = vpop.permute.xlu0 %1988 }
 0xa39   :  { %3390 = vmatmul.mubr.f32.gmra.mrb[26].mxu1 %v5123_v21 }
 0xa3a   :  { %3440 = vmatprep.mubr.msk.f32.mxu1 %vm317_vm2, %v1983_v31 }
 0xa3d   :  { %3441 = vmatmul.mubr.msk.f32.vlgmr.msra.gmra.mrb[28].mxu1 %vm317_vm2, %v1985_v38 }
 0xa3e   :  { %3443 = vmatprep.mubr.msk.f32.mxu1 %vm317_vm2, %v1987_v15  ;;  %3771 = vmatpush3.bf16.msra.mxu1 %v4453_v20 }
 0xa3f   :  { %3773 = vmatprep.subr.bf16.mxu1 %v4458_v22 }
 0xa41   :  { %3444 = vmatmul.mubr.msk.f32.gmra.mrb[30].mxu1 %vm317_vm2, %v1989_v56 }
 0xa42   :  { %3775 = vmatpush3.bf16.msra.mxu1 %v4458_v22 }
 0xa43   :  { %3777 = vmatprep.subr.bf16.mxu1 %v4469_v26 }
 0xa46   :  { %3779 = vmatpush3.bf16.msra.mxu1 %v4469_v26 }
 0xa47   :  { %3781 = vmatprep.subr.bf16.mxu1 %v4479_v44 }
 0xa4a   :  { %3783 = vmatpush3.bf16.msra.mxu1 %v4479_v44 }
 0xa4b   :  { %3785 = vmatprep.subr.bf16.mxu1 %v4538_v48 }
 0xa4e   :  { %3787 = vmatpush3.bf16.msra.mxu1 %v4538_v48 }
 0xa4f   :  { %3789 = vmatprep.subr.bf16.mxu1 %v4548_v50 }
 0xa52   :  { %3791 = vmatpush3.bf16.msra.mxu1 %v4548_v50  ;;  %v1981_v50 = vrot.slane %v5092_v55, %v756_v57 }
 0xa53   :  { %3793 = vmatprep.subr.bf16.mxu1 %v4560_v24 }
 0xa56   :  { %3795 = vmatpush3.bf16.msra.mxu1 %v4560_v24 }
 0xa57   :  { %3797 = vmatprep.subr.bf16.mxu1 %v4570_v63 }
 0xa5a   :  { %3799 = vmatpush3.bf16.msra.mxu1 %v4570_v63 }
 0xb07   :  { %v3388_v20 = vpop.f32.mrb[24].mxu1 }
 0xb08   :  { %v1765_v22 = vmax.f32 %v3388_v20, 1e-20  ;;  %v1745_v26 = vpop.f32.mrb[25].mxu1 }
 0xb09   :  { %v1764_v44 = vmax.f32 %v1745_v26, 1e-20 }
 0xb0b   :  { %4007 = vrcp.f32 %v1764_v44 }
 0xb0c   :  { %4009 = vrcp.f32 %v1765_v22  ;;  %v3391_v42 = vpop.f32.mrb[26].mxu1 }
 0xb0d   :  { %v1755_v48 = vpop.f32.mrb[27].mxu1  ;;  %v1767_v37 = vmax.f32 %v3391_v42, 1e-20 }
 0xb0e   :  { %v1766_v29 = vmax.f32 %v1755_v48, 1e-20 }
 0xb10   :  { %4011 = vrcp.f32 %v1766_v29  ;;  %v3442_v24 = vpop.f32.mrb[28].mxu1 }
 0xb11   :  { %v2070_v2 = vadd.f32 %v3442_v24, %v1981_v50  ;;  %v2064_v41 = vpop.f32.mrb[29].mxu1  ;;  %4013 = vrcp.f32 %v1767_v37 }
 0xb12   :  { %v2065_v63 = vadd.f32 %v2064_v41, %v1981_v50 }
 0xb13   :  { %v2088_v33 = vmul.f32 0.2, %v2070_v2  ;;  %vm2084_vm7 = vcmp.gt.f32.partialorder %v2070_v2, 0.0 }
 0xb14   :  { %v2087_v61 = vmul.f32 0.2, %v2065_v63  ;;  %v3445_v36 = vpop.f32.mrb[30].mxu1  ;;  %vm2083_vm10 = vcmp.gt.f32.partialorder %v2065_v63, 0.0 }
 0xb15   :  { %v4008_v14 = vpop.eup %4007  ;;  %v2080_v49 = vadd.f32 %v3445_v36, %v1981_v50  ;;  %v2074_v28 = vpop.f32.mrb[31].mxu1  ;;  %v2092_v7 = vsel %vm2084_vm7, %v2070_v2, %v2088_v33 }
 0xb16   :  { %v4010_v31 = vpop.eup %4009  ;;  %v2075_v38 = vadd.f32 %v2074_v28, %v1981_v50  ;;  %3394 = vmatprep.mubr.msk.f32.mxu0 %vm317_vm2, %v4008_v14  ;;  %v2096_v3 = vsel %vm428_vm8, %v2092_v7, -1e+30  ;;  %v2091_v57 = vsel %vm2083_vm10, %v2065_v63, %v2087_v61 }
 0xb17   :  { %3395 = vmatmul.mubr.msk.f32.vlgmr.msra.gmra.mrb[28].mxu0 %vm317_vm2, %v4010_v31  ;;  %2101 = vmax.xlane.f32.xlu1 %v2096_v3  ;;  %v2095_v55 = vsel %vm427_vm9, %v2091_v57, -1e+30  ;;  %v2090_v15 = vmul.f32 0.2, %v2080_v49  ;;  %vm2086_vm14 = vcmp.gt.f32.partialorder %v2080_v49, 0.0 }
 0xb18   :  { %v2089_v56 = vmul.f32 0.2, %v2075_v38  ;;  %3739 = vmatpush3.bf16.msra.mxu0 %v4972_v23  ;;  %2099 = vmax.xlane.f32.xlu0 %v2095_v55  ;;  %vm2085_vm11 = vcmp.gt.f32.partialorder %v2075_v38, 0.0 }
 0xb19   :  { %3741 = vmatprep.subr.bf16.mxu0 %v5045_v40  ;;  %v2094_v46 = vsel %vm2086_vm14, %v2080_v49, %v2090_v15 }
 0xb1a   :  { %v4012_v20 = vpop.eup %4011  ;;  %v2093_v22 = vsel %vm2085_vm11, %v2075_v38, %v2089_v56  ;;  %v2098_v23 = vsel %vm430_vm12, %v2094_v46, -1e+30 }
 0xb1b   :  { %3397 = vmatprep.mubr.msk.f32.mxu0 %vm317_vm2, %v4012_v20  ;;  %v2097_v32 = vsel %vm429_vm13, %v2093_v22, -1e+30  ;;  %v4014_v26 = vpop.eup %4013 }
 0xb1c   :  { %3743 = vmatpush3.bf16.msra.mxu0 %v5045_v40  ;;  %2103 = vmax.xlane.f32.xlu1 %v2097_v32 }
 0xb1d   :  { %3398 = vmatmul.mubr.msk.f32.gmra.mrb[30].mxu0 %vm317_vm2, %v4014_v26  ;;  %3745 = vmatprep.subr.bf16.mxu0 %v4974_v12 }
 0xb20   :  { %3747 = vmatpush3.bf16.msra.mxu0 %v4974_v12  ;;  %2105 = vmax.xlane.f32.xlu1 %v2098_v23  ;;  %v5326_v12 = vpack.i.bf16 %v5043_v6, %v5015_v25 }
 0xb21   :  { %3749 = vmatprep.subr.bf16.mxu0 %v5047_v34 }
 0xb24   :  { %3751 = vmatpush3.bf16.msra.mxu0 %v5047_v34 }
 0xb25   :  { %3753 = vmatprep.subr.bf16.mxu0 %v4976_v16 }
 0xb28   :  { %3755 = vmatpush3.bf16.msra.mxu0 %v4976_v16 }
 0xb29   :  { %3757 = vmatprep.subr.bf16.mxu0 %v5049_v11 }
 0xb2c   :  { %3759 = vmatpush3.bf16.msra.mxu0 %v5049_v11 }
 0xb2d   :  { %3761 = vmatprep.subr.bf16.mxu0 %v4978_v17 }
 0xb2e   :  { %3931 = vrot.lane.b32.xlu0 %v3930_v1, %s4122_s20 }
 0xb30   :  { %3763 = vmatpush3.bf16.msra.mxu0 %v4978_v17 }
 0xb31   :  { %3765 = vmatprep.subr.bf16.mxu0 %v5053_v4  ;;  %3926 = vrot.lane.b32.xlu1 %v3925_v39, %s4122_s20 }
 0xb32   :  { %3961 = vrot.lane.b32.xlu0 %v5322_v62, %s4122_s20 }
 0xb34   :  { %3767 = vmatpush3.bf16.msra.mxu0 %v5053_v4 }
 0xb35   :  { %3936 = vrot.lane.b32.xlu1 %v5323_v58, %s4122_s20  ;;  %3484 = vmatprep.subr.msk.mxu0 %vm326_vm1, %v4892_v5 }
 0xb39   :  { %3941 = vrot.lane.b32.xlu1 %v5324_v0, %s4122_s20 }
 0xb3d   :  { %3946 = vrot.lane.b32.xlu1 %v5325_v35, %s4122_s20 }
 0xb41   :  { %3951 = vrot.lane.b32.xlu1 %v5326_v12, %s4122_s20 }
 0xb45   :  { %3956 = vrot.lane.b32.xlu1 %v5327_v53, %s4122_s20 }
 0xba4   :  { %v2102_v9 = vpop.xlane.xlu1 %2101 }
 0xba5   :  { %v2108_v16 = vsub.f32 %v2096_v3, %v2102_v9  ;;  %v2100_v17 = vpop.xlane.xlu0 %2099 }
 0xba6   :  { %v2107_v39 = vsub.f32 %v2095_v55, %v2100_v17 }
 0xba7   :  { %v2113_v52 = vmul.f32 1.442695, %v2108_v16 }
 0xba8   :  { %v2111_v45 = vmul.f32 1.442695, %v2107_v39 }
 0xba9   :  { %v2104_v47 = vpop.xlane.xlu1 %2103  ;;  %v3932_v14 = vpop.permute.xlu0 %3931 }
 0xbaa   :  { %4015 = vpow2.f32 %v2111_v45  ;;  %v2109_v54 = vsub.f32 %v2097_v32, %v2104_v47  ;;  %v3934_v28 = vunpack.i.h.bf16 %v3932_v14 }
 0xbab   :  { %4017 = vpow2.f32 %v2113_v52 }
 0xbac   :  { %v2115_v10 = vmul.f32 1.442695, %v2109_v54 }
 0xbad   :  { %v2106_v13 = vpop.xlane.xlu1 %2105  ;;  %v3962_v16 = vpop.permute.xlu0 %3961 }
 0xbae   :  { %4019 = vpow2.f32 %v2115_v10  ;;  %v2110_v25 = vsub.f32 %v2098_v23, %v2106_v13  ;;  %v3964_v17 = vunpack.i.h.bf16 %v3962_v16  ;;  %v3963_v39 = vunpack.i.l.bf16 %v3962_v16  ;;  %v2553_v16 = vld [vmem:[#allocation2 + $0xe0] sm:$0xff] }
 0xbb0   :  { %v2117_v18 = vmul.f32 1.442695, %v2110_v25  ;;  %v3828_v45 = vpack.c.bf16 %v3964_v17, %v3963_v39  ;;  %v2555_v17 = vld [vmem:[#allocation2 + $0xf0] sm:$0xff] }
 0xbb1   :  { %v3927_v40 = vpop.permute.xlu1 %3926  ;;  %v3862_v39 = vpack.c.bf16 %v2555_v17, %v2553_v16  ;;  %v4067_v17 = vld [vmem:[%s5304_s1 + $0x10] sm:$0xff] }
 0xbb2   :  { %4021 = vpow2.f32 %v2117_v18  ;;  %v3929_v11 = vunpack.i.h.bf16 %v3927_v40  ;;  %v3928_v1 = vunpack.i.l.bf16 %v3927_v40  ;;  %vm2720_vm7 = vcmp.gt.f32.partialorder %v4067_v17, 0.0 }
 0xbb4   :  { %v5210_v8 = vpop.eup %4015  ;;  %v3800_v48 = vpack.c.bf16 %v3929_v11, %v3928_v1 }
 0xbb5   :  { %v5212_v60 = vpop.eup %4017  ;;  %3478 = vmatprep.mubr.f32.mxu1 %v5210_v8 }
 0xbb6   :  { %3479 = vmatmul.mubr.f32.vlgmr.msra.gmra.mrb[32].mxu1 %v5212_v60 }
 0xbb8   :  { %v5216_v27 = vpop.eup %4019 }
 0xbb9   :  { %3481 = vmatprep.mubr.f32.mxu1 %v5216_v27 }
 0xbbc   :  { %v5219_v6 = vpop.eup %4021 }
 0xbbd   :  { %3482 = vmatmul.mubr.f32.gmra.mrb[34].mxu1 %v5219_v6 }
 0xbbe   :  { %2621 = vmatprep.mubr.f32.mxu1 %v5321_v51 }
 0xbea   :  { %v3396_v34 = vpop.f32.mrb[28].mxu0 }
 0xbeb   :  { %v1854_v4 = vpop.f32.mrb[29].mxu0  ;;  %v1874_v42 = vmul.f32 %v5114_v30, %v3396_v34  ;;  %v3937_v30 = vpop.permute.xlu1 %3936 }
 0xbec   :  { %v1873_v44 = vmul.f32 %v5112_v59, %v1854_v4  ;;  %v3939_v38 = vunpack.i.h.bf16 %v3937_v30  ;;  %v3938_v3 = vunpack.i.l.bf16 %v3937_v30  ;;  %v2536_v30 = vld [vmem:[#allocation2 + $0x58] sm:$0xff] }
 0xbee   :  { %3432 = vmatprep.mubr.f32.mxu0 %v1873_v44  ;;  %v3808_v55 = vpack.c.bf16 %v3939_v38, %v3938_v3  ;;  %v2541_v3 = vld [vmem:[#allocation2 + $0x80] sm:$0xff] }
 0xbef   :  { %3433 = vmatmul.mubr.f32.vlgmr.msra.gmra.mrb[32].mxu0 %v1874_v42  ;;  %v3942_v49 = vpop.permute.xlu1 %3941  ;;  %v2526_v42 = vld [vmem:[#allocation2 + $0x8] sm:$0xff] }
 0xbf0   :  { %v3399_v37 = vpop.f32.mrb[30].mxu0  ;;  %3485 = vmatpush3.msk.msra.mxu0 %vm326_vm1, %v4892_v5  ;;  %v3944_v15 = vunpack.i.h.bf16 %v3942_v49  ;;  %v3943_v56 = vunpack.i.l.bf16 %v3942_v49 }
 0xbf1   :  { %v1864_v29 = vpop.f32.mrb[31].mxu0  ;;  %3801 = vmatprep.subr.bf16.mxu0 %v3800_v48  ;;  %v1876_v24 = vmul.f32 %v5123_v21, %v3399_v37  ;;  %v2525_v37 = vld [vmem:[#allocation2] sm:$0xff] }
 0xbf2   :  { %v1875_v50 = vmul.f32 %v5121_v43, %v1864_v29  ;;  %v3933_v43 = vunpack.i.l.bf16 %v3932_v14  ;;  %v3812_v26 = vpack.c.bf16 %v3944_v15, %v3943_v56  ;;  %v2540_v14 = vld [vmem:[#allocation2 + $0x78] sm:$0xff] }
 0xbf3   :  { %v3947_v57 = vpop.permute.xlu1 %3946  ;;  %v2548_v15 = vld [vmem:[#allocation2 + $0xb8] sm:$0xff] }
 0xbf4   :  { %3435 = vmatprep.mubr.f32.mxu0 %v1875_v50  ;;  %v3804_v31 = vpack.c.bf16 %v3934_v28, %v3933_v43  ;;  %v3949_v46 = vunpack.i.h.bf16 %v3947_v57  ;;  %v3948_v23 = vunpack.i.l.bf16 %v3947_v57  ;;  %v2527_v50 = vld [vmem:[#allocation2 + $0x10] sm:$0xff]  ;;  %v2537_v28 = vld [vmem:[#allocation2 + $0x60] sm:$0xff] }
 0xbf5   :  { %3436 = vmatmul.mubr.f32.gmra.mrb[34].mxu0 %v1876_v24  ;;  %v2530_v24 = vld [vmem:[#allocation2 + $0x28] sm:$0xff]  ;;  %v2539_v43 = vld [vmem:[#allocation2 + $0x70] sm:$0xff] }
 0xbf6   :  { %v3816_v62 = vpack.c.bf16 %v3949_v46, %v3948_v23  ;;  %v2543_v57 = vld [vmem:[#allocation2 + $0x90] sm:$0xff]  ;;  %v2552_v46 = vld [vmem:[#allocation2 + $0xd8] sm:$0xff] }
 0xbf7   :  { %v3952_v32 = vpop.permute.xlu1 %3951  ;;  %v3850_v56 = vpack.c.bf16 %v2543_v57, %v2541_v3 }
 0xbf8   :  { %v3954_v58 = vunpack.i.h.bf16 %v3952_v32  ;;  %v3953_v0 = vunpack.i.l.bf16 %v3952_v32  ;;  %v2547_v32 = vld [vmem:[#allocation2 + $0xb0] sm:$0xff] }
 0xbfa   :  { %v3820_v12 = vpack.c.bf16 %v3954_v58, %v3953_v0  ;;  %v2549_v58 = vld [vmem:[#allocation2 + $0xc0] sm:$0xff]  ;;  %v2551_v0 = vld [vmem:[#allocation2 + $0xd0] sm:$0xff] }
 0xbfb   :  { %v3957_v35 = vpop.permute.xlu1 %3956 }
 0xbfc   :  { %v3959_v53 = vunpack.i.h.bf16 %v3957_v35  ;;  %v3958_v9 = vunpack.i.l.bf16 %v3957_v35  ;;  %v3858_v35 = vpack.c.bf16 %v2551_v0, %v2549_v58 }
 0xbfe   :  { %v3824_v52 = vpack.c.bf16 %v3959_v53, %v3958_v9  ;;  %v2556_v53 = vld [vmem:[#allocation2 + $0xf8] sm:$0xff] }
 0xc89   :  { %v3480_v2 = vpop.f32.mrb[32].mxu1 }
 0xc8a   :  { %v2205_v41 = vmax.f32 %v3480_v2, 1e-20  ;;  %v2185_v59 = vpop.f32.mrb[33].mxu1  ;;  %v2532_v2 = vld [vmem:[#allocation2 + $0x38] sm:$0xff] }
 0xc8b   :  { %v2204_v63 = vmax.f32 %v2185_v59, 1e-20  ;;  %v2531_v59 = vld [vmem:[#allocation2 + $0x30] sm:$0xff] }
 0xc8d   :  { %4023 = vrcp.f32 %v2204_v63  ;;  %v2534_v63 = vld [vmem:[#allocation2 + $0x48] sm:$0xff] }
 0xc8e   :  { %4025 = vrcp.f32 %v2205_v41  ;;  %v3836_v41 = vpack.c.bf16 %v2532_v2, %v2530_v24 }
 0xc90   :  { %v3483_v33 = vpop.f32.mrb[34].mxu1 }
 0xc91   :  { %v2207_v61 = vmax.f32 %v3483_v33, 1e-20  ;;  %v2195_v36 = vpop.f32.mrb[35].mxu1  ;;  %v2533_v33 = vld [vmem:[#allocation2 + $0x40] sm:$0xff] }
 0xc92   :  { %v2206_v5 = vmax.f32 %v2195_v36, 1e-20  ;;  %v2538_v36 = vld [vmem:[#allocation2 + $0x68] sm:$0xff] }
 0xc93   :  { %v3844_v49 = vpack.c.bf16 %v2540_v14, %v2538_v36 }
 0xc94   :  { %4027 = vrcp.f32 %v2206_v5 }
 0xc95   :  { %4029 = vrcp.f32 %v2207_v61  ;;  %v2535_v61 = vld [vmem:[#allocation2 + $0x50] sm:$0xff] }
 0xc96   :  { %v3842_v5 = vpack.c.bf16 %v2535_v61, %v2533_v33 }
 0xc97   :  { %v4024_v21 = vpop.eup %4023 }
 0xc98   :  { %v4026_v7 = vpop.eup %4025  ;;  %3486 = vmatprep.mubr.msk.f32.mxu0 %vm317_vm2, %v4024_v21  ;;  %v2542_v21 = vld [vmem:[#allocation2 + $0x88] sm:$0xff] }
 0xc99   :  { %3487 = vmatmul.mubr.msk.f32.vlgmr.msra.gmra.mrb[36].mxu0 %vm317_vm2, %v4026_v7  ;;  %v2544_v7 = vld [vmem:[#allocation2 + $0x98] sm:$0xff] }
 0xc9a   :  { %3803 = vmatpush3.bf16.msra.mxu0 %v3800_v48  ;;  %v2528_v48 = vld [vmem:[#allocation2 + $0x18] sm:$0xff]  ;;  %v3848_v38 = vpack.c.bf16 %v2544_v7, %v2542_v21 }
 0xc9b   :  { %3805 = vmatprep.subr.bf16.mxu0 %v3804_v31  ;;  %v3832_v29 = vpack.c.bf16 %v2528_v48, %v2526_v42 }
 0xc9d   :  { %3833 = vmatprep.subr.bf16.mxu1 %v3832_v29 }
 0xc9e   :  { %v4028_v20 = vpop.eup %4027  ;;  %3807 = vmatpush3.bf16.msra.mxu0 %v3804_v31  ;;  %v3846_v31 = vpack.c.bf16 %v2539_v43, %v2537_v28 }
 0xc9f   :  { %v4030_v22 = vpop.eup %4029  ;;  %3809 = vmatprep.subr.bf16.mxu0 %v3808_v55  ;;  %3489 = vmatprep.mubr.msk.f32.mxu0 %vm317_vm2, %v4028_v20 }
 0xca0   :  { %3490 = vmatmul.mubr.msk.f32.gmra.mrb[38].mxu0 %vm317_vm2, %v4030_v22  ;;  %v2545_v22 = vld [vmem:[#allocation2 + $0xa0] sm:$0xff] }
 0xca1   :  { %v3854_v23 = vpack.c.bf16 %v2547_v32, %v2545_v22 }
 0xca2   :  { %3811 = vmatpush3.bf16.msra.mxu0 %v3808_v55  ;;  %v2546_v55 = vld [vmem:[#allocation2 + $0xa8] sm:$0xff] }
 0xca3   :  { %3813 = vmatprep.subr.bf16.mxu0 %v3812_v26  ;;  %v3852_v20 = vpack.c.bf16 %v2548_v15, %v2546_v55 }
 0xca6   :  { %3815 = vmatpush3.bf16.msra.mxu0 %v3812_v26  ;;  %v2550_v26 = vld [vmem:[#allocation2 + $0xc8] sm:$0xff] }
 0xca7   :  { %3817 = vmatprep.subr.bf16.mxu0 %v3816_v62 }
 0xcaa   :  { %3819 = vmatpush3.bf16.msra.mxu0 %v3816_v62  ;;  %v3856_v62 = vpack.c.bf16 %v2552_v46, %v2550_v26 }
 0xcab   :  { %3821 = vmatprep.subr.bf16.mxu0 %v3820_v12 }
 0xcae   :  { %3823 = vmatpush3.bf16.msra.mxu0 %v3820_v12  ;;  %v2554_v12 = vld [vmem:[#allocation2 + $0xe8] sm:$0xff] }
 0xcaf   :  { %3825 = vmatprep.subr.bf16.mxu0 %v3824_v52  ;;  %v3860_v9 = vpack.c.bf16 %v2556_v53, %v2554_v12 }
 0xcb2   :  { %3827 = vmatpush3.bf16.msra.mxu0 %v3824_v52 }
 0xcb3   :  { %3829 = vmatprep.subr.bf16.mxu0 %v3828_v45 }
 0xcb6   :  { %3831 = vmatpush3.bf16.msra.mxu0 %v3828_v45 }
 0xcc2   :  { %v5233_v47 = vpop.f32.mrb[32].mxu0 }
 0xcc3   :  { %v5235_v54 = vpop.f32.mrb[33].mxu0 }
 0xcc8   :  { %v5237_v10 = vpop.f32.mrb[34].mxu0 }
 0xcc9   :  { %v5239_v13 = vpop.f32.mrb[35].mxu0 }
 0xd6c   :  { %v3488_v25 = vpop.f32.mrb[36].mxu0 }
 0xd6d   :  { %v2294_v18 = vpop.f32.mrb[37].mxu0  ;;  %v2314_v34 = vmul.f32 %v5212_v60, %v3488_v25  ;;  %v2529_v60 = vld [vmem:[#allocation2 + $0x20] sm:$0xff] }
 0xd6e   :  { %v2313_v40 = vmul.f32 %v5210_v8, %v2294_v18  ;;  %v3834_v8 = vpack.c.bf16 %v2527_v50, %v2525_v37 }
 0xd70   :  { %3524 = vmatprep.mubr.f32.mxu0 %v2313_v40  ;;  %3835 = vmatpush1.bf16.msra.mxu1 %v3834_v8  ;;  %v2948_v40 = vld [vmem:[%s5308_s5] ss:$0 sm:$0xff] }
 0xd71   :  { %3525 = vmatmul.mubr.f32.vlgmr.msra.gmra.mrb[40].mxu0 %v2314_v34  ;;  %3837 = vmatprep.subr.bf16.mxu1 %v3836_v41 }
 0xd73   :  { %v3491_v11 = vpop.f32.mrb[38].mxu0 }
 0xd74   :  { %v2304_v1 = vpop.f32.mrb[39].mxu0  ;;  %v2316_v44 = vmul.f32 %v5219_v6, %v3491_v11  ;;  %v3840_v6 = vpack.c.bf16 %v2536_v30, %v2534_v63  ;;  %v4125_v30 = vmov 1  }
 0xd75   :  { %v2315_v4 = vmul.f32 %v5216_v27, %v2304_v1  ;;  %v3838_v27 = vpack.c.bf16 %v2531_v59, %v2529_v60  ;;  %3965 = vset.pattern.permute.xlu1 %v4125_v30  ;;  %3966 = vset.pattern.permute.xlu0 %v4125_v30 }
 0xd77   :  { %3527 = vmatprep.mubr.f32.mxu0 %v2315_v4  ;;  %3839 = vmatpush1.bf16.msra.mxu1 %v3838_v27 }
 0xd78   :  { %3528 = vmatmul.mubr.f32.gmra.mrb[42].mxu0 %v2316_v44  ;;  %3841 = vmatprep.subr.bf16.mxu1 %v3840_v6 }
 0xd7b   :  { %3843 = vmatpush1.bf16.msra.mxu1 %v3842_v5 }
 0xd7c   :  { %3845 = vmatprep.subr.bf16.mxu1 %v3844_v49 }
 0xd7f   :  { %3847 = vmatpush1.bf16.msra.mxu1 %v3846_v31 }
 0xd80   :  { %3849 = vmatprep.subr.bf16.mxu1 %v3848_v38 }
 0xd83   :  { %3851 = vmatpush1.bf16.msra.mxu1 %v3850_v56  ;;  %v4064_v56 = vld [vmem:[%s5304_s1 + $0x18] sm:$0xff] }
 0xd84   :  { %3853 = vmatprep.subr.bf16.mxu1 %v3852_v20  ;;  %v4065_v20 = vld [vmem:[%s5304_s1] sm:$0xff] }
 0xd85   :  { %vm2718_vm12 = vcmp.gt.f32.partialorder %v4065_v20, 0.0 }
 0xd87   :  { %3855 = vmatpush1.bf16.msra.mxu1 %v3854_v23  ;;  %v4066_v23 = vld [vmem:[%s5304_s1 + $0x8] sm:$0xff] }
 0xd88   :  { %3857 = vmatprep.subr.bf16.mxu1 %v3856_v62  ;;  %vm2719_vm5 = vcmp.gt.f32.partialorder %v4066_v23, 0.0 }
 0xd8b   :  { %3859 = vmatpush1.bf16.msra.mxu1 %v3858_v35 }
 0xd8c   :  { %3861 = vmatprep.subr.bf16.mxu1 %v3860_v9 }
 0xd8f   :  { %3863 = vmatpush1.bf16.msra.mxu1 %v3862_v39 }
 0xe44   :  { %v3526_v52 = vpop.f32.mrb[40].mxu0 }
 0xe45   :  { %2488 = vrot.lane.b32.xlu0 %v3526_v52, %s4122_s20  ;;  %v2463_v45 = vpop.f32.mrb[41].mxu0 }
 0xe46   :  { %2486 = vrot.lane.b32.xlu1 %v2463_v45, %s4122_s20 }
 0xe4b   :  { %v3529_v25 = vpop.f32.mrb[42].mxu0 }
 0xe4c   :  { %2492 = vrot.lane.b32.xlu0 %v3529_v25, %s4122_s20  ;;  %v2473_v18 = vpop.f32.mrb[43].mxu0 }
 0xe4d   :  { %2490 = vrot.lane.b32.xlu1 %v2473_v18, %s4122_s20 }
 0xeb7   :  { %v2489_v34 = vpop.permute.xlu0 %2488 }
 0xeb8   :  { %v2499_v11 = vsel %vm102_vm4, %v5233_v47, %v2489_v34  ;;  %v2487_v1 = vpop.permute.xlu1 %2486 }
 0xeb9   :  { %v2498_v4 = vsel %vm102_vm4, %v5235_v54, %v2487_v1  ;;  %v2510_v44 = vadd.f32 %v2948_v40, %v2499_v11 }
 0xeba   :  { %v2509_v42 = vadd.f32 %v2948_v40, %v2498_v4 }
 0xebb   :  { %v2518_v50 = vmul.f32 0.01, %v2510_v44  ;;  %vm2514_vm2 = vcmp.gt.f32.partialorder %v2510_v44, 0.0 }
 0xebc   :  { %vm2513_vm1 = vcmp.gt.f32.partialorder %v2509_v42, 0.0  ;;  %v2517_v48 = vmul.f32 0.01, %v2509_v42 }
 0xebd   :  { %v2522_v41 = vsel %vm2514_vm2, %v2510_v44, %v2518_v50 }
 0xebe   :  { %v2493_v37 = vpop.permute.xlu0 %2492  ;;  %v2521_v29 = vsel %vm2513_vm1, %v2509_v42, %v2517_v48 }
 0xebf   :  { %v2501_v24 = vsel %vm102_vm4, %v5237_v10, %v2493_v37  ;;  %2622 = vmatmul.mubr.f32.vlgmr.msra.gmra.mrb[36].mxu1 %v2521_v29  ;;  %v2491_v2 = vpop.permute.xlu1 %2490 }
 0xec0   :  { %v2500_v47 = vsel %vm102_vm4, %v5239_v13, %v2491_v2  ;;  %2627 = vmatprep.mubr.f32.mxu1 %v5321_v51  ;;  %v2512_v54 = vadd.f32 %v2948_v40, %v2501_v24  ;;  %vm2721_vm4 = vcmp.gt.f32.partialorder %v4064_v56, 0.0 }
 0xec1   :  { %v2511_v8 = vadd.f32 %v2948_v40, %v2500_v47 }
 0xec2   :  { %v2520_v63 = vmul.f32 0.01, %v2512_v54  ;;  %vm2516_vm9 = vcmp.gt.f32.partialorder %v2512_v54, 0.0 }
 0xec3   :  { %2628 = vmatmul.mubr.f32.gmra.mrb[38].mxu1 %v2522_v41  ;;  %vm2515_vm8 = vcmp.gt.f32.partialorder %v2511_v8, 0.0  ;;  %v2519_v60 = vmul.f32 0.01, %v2511_v8 }
 0xec4   :  { %2633 = vmatprep.mubr.f32.mxu1 %v5321_v51  ;;  %v2524_v10 = vsel %vm2516_vm9, %v2512_v54, %v2520_v63 }
 0xec5   :  { %v2523_v59 = vsel %vm2515_vm8, %v2511_v8, %v2519_v60 }
 0xec7   :  { %2634 = vmatmul.mubr.f32.gmra.mrb[40].mxu1 %v2523_v59 }
 0xec8   :  { %2639 = vmatprep.mubr.f32.mxu1 %v5321_v51 }
 0xecb   :  { %2640 = vmatmul.mubr.f32.gmra.mrb[42].mxu1 %v2524_v10 }
 0xf92   :  { %v2623_v13 = vpop.f32.mrb[36].mxu1 }
 0xf93   :  { %v2625_v27 = vpop.f32.mrb[37].mxu1 }
 0xf94   :  { %2680 = vperm.xlu1 %3965, %v2625_v27  }
 0xf96   :  { %v2629_v6 = vpop.f32.mrb[38].mxu1 }
 0xf97   :  { %v3864_v33 = vpack.c.bf16 %v2629_v6, %v2623_v13  ;;  %v2631_v61 = vpop.f32.mrb[39].mxu1 }
 0xf98   :  { %2685 = vperm.xlu0 %3966, %v2631_v61  }
 0xf99   :  { %3865 = vmatprep.subr.bf16.mxu0 %v3864_v33 }
 0xf9a   :  { %v2635_v36 = vpop.f32.mrb[40].mxu1  ;;  %3867 = vmatpush3.bf16.msra.mxu0 %v3864_v33 }
 0xf9b   :  { %v2637_v14 = vpop.f32.mrb[41].mxu1 }
 0xf9c   :  { %2690 = vperm.xlu1 %3965, %v2637_v14  }
 0xf9e   :  { %v2641_v5 = vpop.f32.mrb[42].mxu1 }
 0xf9f   :  { %v3868_v49 = vpack.c.bf16 %v2641_v5, %v2635_v36  ;;  %v2643_v51 = vpop.f32.mrb[43].mxu1 }
 0xfa0   :  { %2695 = vperm.xlu1 %3965, %v2643_v51  }
 0xfa1   :  { %3869 = vmatprep.subr.bf16.mxu0 %v3868_v49 }
 0xfa2   :  { %3871 = vmatpush3.bf16.msra.mxu0 %v3868_v49 }
 0xfb6   :  { %2646 = vxpose.xlu0.b32.start [1/4] (short) (narrow) %v2625_v27, 8 }
 0xfba   :  { %2647 = vxpose.xlu0.b32.cont [2/4] (short) (narrow) %v2631_v61, 8 }
 0xfbe   :  { %2648 = vxpose.xlu0.b32.cont [3/4] (short) (narrow) %v2637_v14, 8 }
 0xfc2   :  { %2649 = vxpose.xlu0.b32.end [4/4] (short) (narrow) %v2643_v51, 8 }
0x1013   :  { %v2681_v28 = vpop.permute.xlu1 %2680 }
0x1017   :  { %v2686_v43 = vpop.permute.xlu0 %2685 }
0x101b   :  { %v2691_v21 = vpop.permute.xlu1 %2690 }
0x101f   :  { %v2696_v38 = vpop.permute.xlu1 %2695 }
0x1036   :  { %v2662_v7 = vpop.trf.xlu0 }
0x1037   :  { %v2701_v31 = vrot.slane %v2662_v7, %v4489_v19 }
0x1039   :  { %v2705_v3 = vadd.f32 %v2701_v31, %v2696_v38  ;;  %v2702_v57 = vadd.f32 %v2701_v31, %v2681_v28  ;;  %v2703_v55 = vadd.f32 %v2701_v31, %v2686_v43  ;;  %v2704_v15 = vadd.f32 %v2701_v31, %v2691_v21  ;;  %v2949_v21 = vld [vmem:[%s5310_s7] ss:$0 sm:$0xff] }
0x103b   :  { %vm2709_vm13 = vcmp.gt.f32.partialorder %v2705_v3, 0.0  ;;  %v2713_v22 = vmul.f32 0.2, %v2705_v3  ;;  %vm2706_vm15 = vcmp.gt.f32.partialorder %v2702_v57, 0.0  ;;  %v2710_v32 = vmul.f32 0.2, %v2702_v57 }
0x103c   :  { %vm2707_vm0 = vcmp.gt.f32.partialorder %v2703_v55, 0.0  ;;  %v2711_v19 = vmul.f32 0.2, %v2703_v55  ;;  %v2712_v62 = vmul.f32 0.2, %v2704_v15  ;;  %vm2708_vm6 = vcmp.gt.f32.partialorder %v2704_v15, 0.0 }
0x103d   :  { %v2717_v26 = vsel %vm2709_vm13, %v2705_v3, %v2713_v22  ;;  %v2714_v46 = vsel %vm2706_vm15, %v2702_v57, %v2710_v32 }
0x103e   :  { %v2725_v58 = vsel %vm2721_vm4, %v2717_v26, -1e+30  ;;  %v2722_v0 = vsel %vm2718_vm12, %v2714_v46, -1e+30  ;;  %v2715_v35 = vsel %vm2707_vm0, %v2703_v55, %v2711_v19  ;;  %v2716_v16 = vsel %vm2708_vm6, %v2704_v15, %v2712_v62 }
0x103f   :  { %v2735_v12 = vsel %vm97_vm3, %v2725_v58, -inf  ;;  %v2726_v53 = vsel %vm97_vm3, %v2722_v0, -inf  ;;  %v2723_v9 = vsel %vm2719_vm5, %v2715_v35, -1e+30  ;;  %v2724_v52 = vsel %vm2720_vm7, %v2716_v16, -1e+30 }
0x1040   :  { %2736 = vmax.xlane.f32.xlu0 %v2735_v12  ;;  %2727 = vmax.xlane.f32.xlu1 %v2726_v53  ;;  %v2729_v39 = vsel %vm97_vm3, %v2723_v9, -inf  ;;  %v2732_v45 = vsel %vm97_vm3, %v2724_v52, -inf }
0x1044   :  { %2730 = vmax.xlane.f32.xlu1 %v2729_v39 }
0x1048   :  { %2733 = vmax.xlane.f32.xlu1 %v2732_v45 }
0x10cd   :  { %v2728_v25 = vpop.xlane.xlu1 %2727  ;;  %v2737_v11 = vpop.xlane.xlu0 %2736 }
0x10ce   :  { %v2738_v18 = vsub.f32 %v2722_v0, %v2728_v25  ;;  %v2741_v44 = vsub.f32 %v2725_v58, %v2737_v11 }
0x10d0   :  { %v2742_v40 = vmul.f32 1.442695, %v2738_v18  ;;  %v2748_v29 = vmul.f32 1.442695, %v2741_v44 }
0x10d1   :  { %v2731_v34 = vpop.xlane.xlu1 %2730 }
0x10d2   :  { %v2739_v1 = vsub.f32 %v2723_v9, %v2731_v34  ;;  %4031 = vpow2.f32 %v2742_v40 }
0x10d4   :  { %v2744_v4 = vmul.f32 1.442695, %v2739_v1 }
0x10d5   :  { %v2734_v42 = vpop.xlane.xlu1 %2733 }
0x10d6   :  { %4033 = vpow2.f32 %v2744_v4  ;;  %v2740_v48 = vsub.f32 %v2724_v52, %v2734_v42 }
0x10d8   :  { %v2746_v37 = vmul.f32 1.442695, %v2740_v48 }
0x10da   :  { %4035 = vpow2.f32 %v2746_v37 }
0x10db   :  { %4037 = vpow2.f32 %v2748_v29 }
0x10dc   :  { %v4032_v50 = vpop.eup %4031 }
0x10dd   :  { %v2750_v24 = vsel %vm97_vm3, %v4032_v50, 0.0 }
0x10de   :  { %2751 = vadd.xlane.f32.xlu1 %v2750_v24 }
0x10e0   :  { %v4034_v2 = vpop.eup %4033 }
0x10e1   :  { %v2753_v47 = vsel %vm97_vm3, %v4034_v2, 0.0 }
0x10e2   :  { %2754 = vadd.xlane.f32.xlu1 %v2753_v47 }
0x10e4   :  { %v4036_v8 = vpop.eup %4035 }
0x10e5   :  { %v2756_v54 = vsel %vm97_vm3, %v4036_v8, 0.0  ;;  %v4038_v41 = vpop.eup %4037 }
0x10e6   :  { %2757 = vadd.xlane.f32.xlu1 %v2756_v54  ;;  %v2759_v60 = vsel %vm97_vm3, %v4038_v41, 0.0 }
0x10ea   :  { %2760 = vadd.xlane.f32.xlu1 %v2759_v60 }
0x116b   :  { %v2752_v59 = vpop.xlane.xlu1 %2751 }
0x116c   :  { %v2762_v63 = vmax.f32 %v2752_v59, 1e-20 }
0x116e   :  { %4039 = vrcp.f32 %v2762_v63 }
0x116f   :  { %v2755_v10 = vpop.xlane.xlu1 %2754 }
0x1170   :  { %v2763_v30 = vmax.f32 %v2755_v10, 1e-20 }
0x1172   :  { %4041 = vrcp.f32 %v2763_v30 }
0x1173   :  { %v2758_v13 = vpop.xlane.xlu1 %2757 }
0x1174   :  { %v2764_v27 = vmax.f32 %v2758_v13, 1e-20 }
0x1176   :  { %4043 = vrcp.f32 %v2764_v27 }
0x1177   :  { %v2761_v6 = vpop.xlane.xlu1 %2760 }
0x1178   :  { %v4040_v33 = vpop.eup %4039  ;;  %v2765_v61 = vmax.f32 %v2761_v6, 1e-20 }
0x1179   :  { %v2774_v36 = vmul.f32 %v4040_v33, %v4032_v50 }
0x117a   :  { %4045 = vrcp.f32 %v2765_v61 }
0x117b   :  { %3538 = vmatprep.mubr.msk.f32.mxu0 %vm97_vm3, %v2774_v36 }
0x117c   :  { %v4042_v14 = vpop.eup %4041 }
0x117d   :  { %v2775_v5 = vmul.f32 %v4042_v14, %v4034_v2 }
0x117f   :  { %3539 = vmatmul.mubr.msk.f32.vlgmr.msra.gmra.mrb[44].mxu0 %vm97_vm3, %v2775_v5 }
0x1180   :  { %v4044_v49 = vpop.eup %4043 }
0x1181   :  { %v2776_v51 = vmul.f32 %v4044_v49, %v4036_v8 }
0x1183   :  { %3541 = vmatprep.mubr.msk.f32.mxu0 %vm97_vm3, %v2776_v51 }
0x1184   :  { %v4046_v28 = vpop.eup %4045 }
0x1185   :  { %v2777_v43 = vmul.f32 %v4046_v28, %v4038_v41 }
0x1187   :  { %3542 = vmatmul.mubr.msk.f32.gmra.mrb[46].mxu0 %vm97_vm3, %v2777_v43 }
0x1252   :  { %v3540_v7 = vpop.f32.mrb[44].mxu0 }
0x1253   :  { %v2869_v31 = vadd.f32 %v3540_v7, %v2949_v21  ;;  %v2863_v38 = vpop.f32.mrb[45].mxu0 }
0x1254   :  { %v2864_v3 = vadd.f32 %v2949_v21, %v2863_v38 }
0x1255   :  { %2883 = vst [vmem:[#allocation5 + $0x8] sm:$0xff] %v2869_v31 }
0x1256   :  { %2882 = vst [vmem:[#allocation5] sm:$0xff] %v2864_v3 }
0x125a   :  { %v3543_v57 = vpop.f32.mrb[46].mxu0 }
0x125b   :  { %v2879_v55 = vadd.f32 %v3543_v57, %v2949_v21  ;;  %v2873_v15 = vpop.f32.mrb[47].mxu0 }
0x125c   :  { %v2874_v56 = vadd.f32 %v2949_v21, %v2873_v15 }
0x125d   :  { %2885 = vst [vmem:[#allocation5 + $0x18] sm:$0xff] %v2879_v55 }
0x125e   :  { %2884 = vst [vmem:[#allocation5 + $0x10] sm:$0xff] %v2874_v56 }
0x125f   :  { %4101 = shalt.err (!%p4098_p12)
}
0x1260   :  { %s4102_s4 = scalar_lea.hbm %s5314_s11, 512 }
0x1261   :  { %p4103_p13 = scmp.ne.s32.totalorder %s5314_s11, %s4102_s4  ;;  %p4106_p0 = scmp.lt.u32.totalorder %s4102_s4, %s5314_s11 }
0x1263   :  { %p4108_p1 = pnand %p4106_p0, %p4103_p13 }
0x1265   :  { %4111 = shalt.err (!%p4108_p1)
}
0x1266   :  { %s4127_s17 = smov 128   ;;  %s4128_s18 = smov 8  }
0x1267   :  { %2897 = dma.vmem_to_hbm [thread:$0]  %s2892_s29, 512, %s5314_s11, [#allocation4], %s4127_s17, %s4127_s17, %s4128_s18  }
0x1268   :  { %4114 = dma.done.wait [#allocation4], 512  }
0x1269   :  { %4115 = vsyncadd [#allocation4], 4294966784 }
0x126a   :  { %2901 = vsyncpa [#allocation3], 1 }
0x126b   :  { %2902 = vsyncpa [#allocation4], 1 }

</bundles_post_ra>
